<compile_context>
chip_gen: v7x
topology: tpu7x:2x2x1
jax: 0.10.0
libtpu: 0.0.40
codegen_flags: <defaults>
</compile_context>

<pallas_src>
import functools

import jax
import jax.numpy as jnp
from jax.experimental import pallas as pl
from jax.experimental.pallas import tpu as pltpu


def _make_rk4_step(a, wt, b_full):
    """Returns rk4(y, dt) for dX/dt = relu((A @ X) @ W^T + b)."""

    def f(y):
        h = jnp.dot(a, y, preferred_element_type=jnp.float32)
        h = jnp.dot(h, wt, preferred_element_type=jnp.float32) + b_full
        return jnp.maximum(h, 0.0)

    def rk4(y, dt):
        k1 = f(y)
        k2 = f(y + (0.5 * dt) * k1)
        acc = k1 + 2.0 * k2
        k3 = f(y + (0.5 * dt) * k2)
        acc = acc + 2.0 * k3
        k4 = f(y + dt * k3)
        acc = acc + k4
        return y + (dt / 6.0) * acc

    return rk4


def _loop_unroll(num_steps):
    """Fully unroll small static trip counts; partially otherwise."""
    if num_steps <= 16:
        return True
    return 4


def _ode_traj_kernel(dt_ref, x0_ref, a_ref, wt_ref, b_ref, out_ref):
    """Single-invocation kernel: whole RK4 trajectory, out_ref is (T, N, H)."""
    a = a_ref[...]                                  # (N, N)
    wt = wt_ref[...]                                # (H, H)  (already W^T)
    # Hoist the bias broadcast: done once, not 4x per RK4 step.
    b_full = jnp.broadcast_to(b_ref[...], x0_ref.shape)   # (N, H)
    rk4 = _make_rk4_step(a, wt, b_full)

    x0 = x0_ref[...]                                # (N, H)
    out_ref[0] = x0                                 # trajectory[0] = x

    num_steps = dt_ref.shape[0]                     # T - 1 (static)

    def body(t, y):
        y_new = rk4(y, dt_ref[t])                   # dt scalar from SMEM
        out_ref[t + 1] = y_new                      # dynamic store along time
        return y_new

    jax.lax.fori_loop(0, num_steps, body, x0, unroll=_loop_unroll(num_steps))


def _ode_terminal_kernel(dt_ref, x0_ref, a_ref, wt_ref, b_ref, out_ref):
    """Single-invocation kernel: only the final state, out_ref is (N, H)."""
    a = a_ref[...]
    wt = wt_ref[...]
    b_full = jnp.broadcast_to(b_ref[...], x0_ref.shape)
    rk4 = _make_rk4_step(a, wt, b_full)

    x0 = x0_ref[...]
    num_steps = dt_ref.shape[0]

    def body(t, y):
        return rk4(y, dt_ref[t])

    out_ref[...] = jax.lax.fori_loop(
        0, num_steps, body, x0, unroll=_loop_unroll(num_steps)
    )


@functools.partial(jax.jit, static_argnames=("terminal",))
def ode_block2_forward(x, vt, A, W, b, *, terminal=False):
    """Pallas ODEBlock2 forward.

    x  : (N, H) float32 initial node states
    vt : (T,)   float32 integration time vector
    A  : (N, N) graph operator, W: (H, H), b: (H,) Linear params.
    Returns (T, N, H) trajectory if terminal=False, else (N, H) final state.
    """
    N, H = x.shape
    T = vt.shape[0]

    dt = (vt[1:] - vt[:-1]).astype(jnp.float32)     # (T-1,)
    wt = W.T.astype(jnp.float32)                    # pre-transpose: y @ W.T == y @ wt
    b2d = b.reshape(1, H).astype(jnp.float32)
    x32 = x.astype(jnp.float32)
    A32 = A.astype(jnp.float32)

    vmem = pl.BlockSpec(memory_space=pltpu.MemorySpace.VMEM)
    smem = pl.BlockSpec(memory_space=pltpu.MemorySpace.SMEM)
    in_specs = [smem, vmem, vmem, vmem, vmem]

    if terminal:
        kernel = _ode_terminal_kernel
        out_shape = jax.ShapeDtypeStruct((N, H), jnp.float32)
    else:
        kernel = _ode_traj_kernel
        out_shape = jax.ShapeDtypeStruct((T, N, H), jnp.float32)

    return pl.pallas_call(
        kernel,
        out_shape=out_shape,
        in_specs=in_specs,
        out_specs=vmem,
        compiler_params=pltpu.CompilerParams(vmem_limit_bytes=64 << 20),
    )(dt, x32, A32, wt, b2d)


def _reference_forward(x, vt, A, W, b, terminal=False):
    """Pure-JAX RK4 reference (same fixed-grid semantics)."""

    def f(y):
        return jnp.maximum(A @ y @ W.T + b[None, :], 0.0)

    def step(y, dt):
        k1 = f(y)
        k2 = f(y + 0.5 * dt * k1)
        k3 = f(y + 0.5 * dt * k2)
        k4 = f(y + dt * k3)
        y_new = y + (dt / 6.0) * (k1 + 2.0 * k2 + 2.0 * k3 + k4)
        return y_new, y_new

    _, ys = jax.lax.scan(step, x, vt[1:] - vt[:-1])
    traj = jnp.concatenate([x[None], ys], axis=0)
    return traj[-1] if terminal else traj


if __name__ == "__main__":
    key = jax.random.PRNGKey(0)
    k_x, k_a, k_w, k_b = jax.random.split(key, 4)

    N, H, T = 16, 32, 8  # nodes, hidden size, number of time points

    x = jax.random.normal(k_x, (N, H), dtype=jnp.float32)
    # random symmetric, row-normalized "adjacency"-like operator
    A_raw = jnp.abs(jax.random.normal(k_a, (N, N), dtype=jnp.float32))
    A_sym = 0.5 * (A_raw + A_raw.T)
    A = A_sym / jnp.sum(A_sym, axis=1, keepdims=True)
    W = 0.1 * jax.random.normal(k_w, (H, H), dtype=jnp.float32)
    b = 0.1 * jax.random.normal(k_b, (H,), dtype=jnp.float32)
    vt = jnp.linspace(0.0, 1.0, T).astype(jnp.float32)

    # trajectory path (terminal=False)
    out = ode_block2_forward(x, vt, A, W, b, terminal=False)
    out = jax.block_until_ready(out)
    ref = _reference_forward(x, vt, A, W, b, terminal=False)
    assert out.shape == (T, N, H), out.shape
    assert jnp.allclose(out, ref, rtol=1e-4, atol=1e-4), float(
        jnp.max(jnp.abs(out - ref))
    )

    # terminal path (terminal=True): only the final state is produced
    out_last = ode_block2_forward(x, vt, A, W, b, terminal=True)
    out_last = jax.block_until_ready(out_last)
    ref_last = _reference_forward(x, vt, A, W, b, terminal=True)
    assert out_last.shape == (N, H), out_last.shape
    assert jnp.allclose(out_last, ref_last, rtol=1e-4, atol=1e-4), float(
        jnp.max(jnp.abs(out_last - ref_last))
    )

    print("KERNEL_OK")
</pallas_src>

<mosaic_0001>
module attributes {stable_mosaic.version = 11 : i64} {
  func.func @_ode_traj_kernel(%arg0: memref<7xf32, #tpu.memory_space<smem>>, %arg1: memref<16x32xf32, #tpu.memory_space<vmem>>, %arg2: memref<16x16xf32, #tpu.memory_space<vmem>>, %arg3: memref<32x32xf32, #tpu.memory_space<vmem>>, %arg4: memref<1x32xf32, #tpu.memory_space<vmem>>, %arg5: memref<8x16x32xf32, #tpu.memory_space<vmem>>) attributes {dimension_semantics = [], scalar_prefetch = 0 : i64, scratch_operands = 0 : i64, tpu.core_type = #tpu.core_type<tc>} {
    %c0 = arith.constant 0 : index
    %c0_0 = arith.constant 0 : index
    %0 = vector.load %arg2[%c0, %c0_0] : memref<16x16xf32, #tpu.memory_space<vmem>>, vector<16x16xf32>
    %c0_1 = arith.constant 0 : index
    %c0_2 = arith.constant 0 : index
    %1 = vector.load %arg3[%c0_1, %c0_2] : memref<32x32xf32, #tpu.memory_space<vmem>>, vector<32x32xf32>
    %c0_3 = arith.constant 0 : index
    %c0_4 = arith.constant 0 : index
    %2 = vector.load %arg4[%c0_3, %c0_4] : memref<1x32xf32, #tpu.memory_space<vmem>>, vector<1x32xf32>
    %3 = vector.shape_cast %2 : vector<1x32xf32> to vector<1x32xf32>
    %4 = vector.broadcast %3 : vector<1x32xf32> to vector<16x32xf32>
    %c0_5 = arith.constant 0 : index
    %c0_6 = arith.constant 0 : index
    %5 = vector.load %arg1[%c0_5, %c0_6] : memref<16x32xf32, #tpu.memory_space<vmem>>, vector<16x32xf32>
    %c0_7 = arith.constant 0 : index
    %c0_8 = arith.constant 0 : index
    %c0_9 = arith.constant 0 : index
    %6 = vector.load %arg5[%c0_7, %c0_8, %c0_9] : memref<8x16x32xf32, #tpu.memory_space<vmem>>, vector<1x16x32xf32>
    %7 = vector.shape_cast %6 : vector<1x16x32xf32> to vector<16x32xf32>
    %8 = vector.shape_cast %5 : vector<16x32xf32> to vector<1x16x32xf32>
    tpu.vector_store %arg5[%c0_7, %c0_8, %c0_9], %8 {strides = array<i32>} : memref<8x16x32xf32, #tpu.memory_space<vmem>>, vector<1x16x32xf32>,
    %c0_i32 = arith.constant 0 : i32
    %9 = arith.index_cast %c0_i32 : i32 to index
    %10 = memref.load %arg0[%9] : memref<7xf32, #tpu.memory_space<smem>>
    %cst = arith.constant dense<0.000000e+00> : vector<16x32xf32>
    %11 = tpu.matmul %0, %5, %cst {dimension_numbers = #tpu.dot_dimension_numbers<[1], [0], [0], [1], [0, 0, 1, 1], [], []>} : vector<16x16xf32>, vector<16x32xf32>, vector<16x32xf32> -> vector<16x32xf32>
    %cst_10 = arith.constant dense<0.000000e+00> : vector<16x32xf32>
    %12 = tpu.matmul %11, %1, %cst_10 {dimension_numbers = #tpu.dot_dimension_numbers<[1], [0], [0], [1], [0, 0, 1, 1], [], []>} : vector<16x32xf32>, vector<32x32xf32>, vector<16x32xf32> -> vector<16x32xf32>
    %13 = arith.addf %12, %4 : vector<16x32xf32>
    %cst_11 = arith.constant 0.000000e+00 : f32
    %14 = vector.broadcast %cst_11 : f32 to vector<16x32xf32>
    %15 = arith.maximumf %13, %14 : vector<16x32xf32>
    %cst_12 = arith.constant 5.000000e-01 : f32
    %16 = arith.mulf %cst_12, %10 : f32
    %17 = vector.broadcast %16 : f32 to vector<16x32xf32>
    %18 = arith.mulf %17, %15 : vector<16x32xf32>
    %19 = arith.addf %5, %18 : vector<16x32xf32>
    %cst_13 = arith.constant dense<0.000000e+00> : vector<16x32xf32>
    %20 = tpu.matmul %0, %19, %cst_13 {dimension_numbers = #tpu.dot_dimension_numbers<[1], [0], [0], [1], [0, 0, 1, 1], [], []>} : vector<16x16xf32>, vector<16x32xf32>, vector<16x32xf32> -> vector<16x32xf32>
    %cst_14 = arith.constant dense<0.000000e+00> : vector<16x32xf32>
    %21 = tpu.matmul %20, %1, %cst_14 {dimension_numbers = #tpu.dot_dimension_numbers<[1], [0], [0], [1], [0, 0, 1, 1], [], []>} : vector<16x32xf32>, vector<32x32xf32>, vector<16x32xf32> -> vector<16x32xf32>
    %22 = arith.addf %21, %4 : vector<16x32xf32>
    %cst_15 = arith.constant 0.000000e+00 : f32
    %23 = vector.broadcast %cst_15 : f32 to vector<16x32xf32>
    %24 = arith.maximumf %22, %23 : vector<16x32xf32>
    %cst_16 = arith.constant 2.000000e+00 : f32
    %25 = vector.broadcast %cst_16 : f32 to vector<16x32xf32>
    %26 = arith.mulf %25, %24 : vector<16x32xf32>
    %27 = arith.addf %15, %26 : vector<16x32xf32>
    %cst_17 = arith.constant 5.000000e-01 : f32
    %28 = arith.mulf %cst_17, %10 : f32
    %29 = vector.broadcast %28 : f32 to vector<16x32xf32>
    %30 = arith.mulf %29, %24 : vector<16x32xf32>
    %31 = arith.addf %5, %30 : vector<16x32xf32>
    %cst_18 = arith.constant dense<0.000000e+00> : vector<16x32xf32>
    %32 = tpu.matmul %0, %31, %cst_18 {dimension_numbers = #tpu.dot_dimension_numbers<[1], [0], [0], [1], [0, 0, 1, 1], [], []>} : vector<16x16xf32>, vector<16x32xf32>, vector<16x32xf32> -> vector<16x32xf32>
    %cst_19 = arith.constant dense<0.000000e+00> : vector<16x32xf32>
    %33 = tpu.matmul %32, %1, %cst_19 {dimension_numbers = #tpu.dot_dimension_numbers<[1], [0], [0], [1], [0, 0, 1, 1], [], []>} : vector<16x32xf32>, vector<32x32xf32>, vector<16x32xf32> -> vector<16x32xf32>
    %34 = arith.addf %33, %4 : vector<16x32xf32>
    %cst_20 = arith.constant 0.000000e+00 : f32
    %35 = vector.broadcast %cst_20 : f32 to vector<16x32xf32>
    %36 = arith.maximumf %34, %35 : vector<16x32xf32>
    %cst_21 = arith.constant 2.000000e+00 : f32
    %37 = vector.broadcast %cst_21 : f32 to vector<16x32xf32>
    %38 = arith.mulf %37, %36 : vector<16x32xf32>
    %39 = arith.addf %27, %38 : vector<16x32xf32>
    %40 = vector.broadcast %10 : f32 to vector<16x32xf32>
    %41 = arith.mulf %40, %36 : vector<16x32xf32>
    %42 = arith.addf %5, %41 : vector<16x32xf32>
    %cst_22 = arith.constant dense<0.000000e+00> : vector<16x32xf32>
    %43 = tpu.matmul %0, %42, %cst_22 {dimension_numbers = #tpu.dot_dimension_numbers<[1], [0], [0], [1], [0, 0, 1, 1], [], []>} : vector<16x16xf32>, vector<16x32xf32>, vector<16x32xf32> -> vector<16x32xf32>
    %cst_23 = arith.constant dense<0.000000e+00> : vector<16x32xf32>
    %44 = tpu.matmul %43, %1, %cst_23 {dimension_numbers = #tpu.dot_dimension_numbers<[1], [0], [0], [1], [0, 0, 1, 1], [], []>} : vector<16x32xf32>, vector<32x32xf32>, vector<16x32xf32> -> vector<16x32xf32>
    %45 = arith.addf %44, %4 : vector<16x32xf32>
    %cst_24 = arith.constant 0.000000e+00 : f32
    %46 = vector.broadcast %cst_24 : f32 to vector<16x32xf32>
    %47 = arith.maximumf %45, %46 : vector<16x32xf32>
    %48 = arith.addf %39, %47 : vector<16x32xf32>
    %cst_25 = arith.constant 6.000000e+00 : f32
    %49 = arith.divf %10, %cst_25 : f32
    %50 = vector.broadcast %49 : f32 to vector<16x32xf32>
    %51 = arith.mulf %50, %48 : vector<16x32xf32>
    %52 = arith.addf %5, %51 : vector<16x32xf32>
    %c1_i32 = arith.constant 1 : i32
    %53 = arith.addi %c0_i32, %c1_i32 : i32
    %54 = arith.index_cast %53 : i32 to index
    %c0_26 = arith.constant 0 : index
    %c0_27 = arith.constant 0 : index
    %55 = vector.load %arg5[%54, %c0_26, %c0_27] : memref<8x16x32xf32, #tpu.memory_space<vmem>>, vector<1x16x32xf32>
    %56 = vector.shape_cast %55 : vector<1x16x32xf32> to vector<16x32xf32>
    %57 = vector.shape_cast %52 : vector<16x32xf32> to vector<1x16x32xf32>
    tpu.vector_store %arg5[%54, %c0_26, %c0_27], %57 {strides = array<i32>} : memref<8x16x32xf32, #tpu.memory_space<vmem>>, vector<1x16x32xf32>,
    %c1_i32_28 = arith.constant 1 : i32
    %58 = arith.index_cast %c1_i32_28 : i32 to index
    %59 = memref.load %arg0[%58] : memref<7xf32, #tpu.memory_space<smem>>
    %cst_29 = arith.constant dense<0.000000e+00> : vector<16x32xf32>
    %60 = tpu.matmul %0, %52, %cst_29 {dimension_numbers = #tpu.dot_dimension_numbers<[1], [0], [0], [1], [0, 0, 1, 1], [], []>} : vector<16x16xf32>, vector<16x32xf32>, vector<16x32xf32> -> vector<16x32xf32>
    %cst_30 = arith.constant dense<0.000000e+00> : vector<16x32xf32>
    %61 = tpu.matmul %60, %1, %cst_30 {dimension_numbers = #tpu.dot_dimension_numbers<[1], [0], [0], [1], [0, 0, 1, 1], [], []>} : vector<16x32xf32>, vector<32x32xf32>, vector<16x32xf32> -> vector<16x32xf32>
    %62 = arith.addf %61, %4 : vector<16x32xf32>
    %cst_31 = arith.constant 0.000000e+00 : f32
    %63 = vector.broadcast %cst_31 : f32 to vector<16x32xf32>
    %64 = arith.maximumf %62, %63 : vector<16x32xf32>
    %cst_32 = arith.constant 5.000000e-01 : f32
    %65 = arith.mulf %cst_32, %59 : f32
    %66 = vector.broadcast %65 : f32 to vector<16x32xf32>
    %67 = arith.mulf %66, %64 : vector<16x32xf32>
    %68 = arith.addf %52, %67 : vector<16x32xf32>
    %cst_33 = arith.constant dense<0.000000e+00> : vector<16x32xf32>
    %69 = tpu.matmul %0, %68, %cst_33 {dimension_numbers = #tpu.dot_dimension_numbers<[1], [0], [0], [1], [0, 0, 1, 1], [], []>} : vector<16x16xf32>, vector<16x32xf32>, vector<16x32xf32> -> vector<16x32xf32>
    %cst_34 = arith.constant dense<0.000000e+00> : vector<16x32xf32>
    %70 = tpu.matmul %69, %1, %cst_34 {dimension_numbers = #tpu.dot_dimension_numbers<[1], [0], [0], [1], [0, 0, 1, 1], [], []>} : vector<16x32xf32>, vector<32x32xf32>, vector<16x32xf32> -> vector<16x32xf32>
    %71 = arith.addf %70, %4 : vector<16x32xf32>
    %cst_35 = arith.constant 0.000000e+00 : f32
    %72 = vector.broadcast %cst_35 : f32 to vector<16x32xf32>
    %73 = arith.maximumf %71, %72 : vector<16x32xf32>
    %cst_36 = arith.constant 2.000000e+00 : f32
    %74 = vector.broadcast %cst_36 : f32 to vector<16x32xf32>
    %75 = arith.mulf %74, %73 : vector<16x32xf32>
    %76 = arith.addf %64, %75 : vector<16x32xf32>
    %cst_37 = arith.constant 5.000000e-01 : f32
    %77 = arith.mulf %cst_37, %59 : f32
    %78 = vector.broadcast %77 : f32 to vector<16x32xf32>
    %79 = arith.mulf %78, %73 : vector<16x32xf32>
    %80 = arith.addf %52, %79 : vector<16x32xf32>
    %cst_38 = arith.constant dense<0.000000e+00> : vector<16x32xf32>
    %81 = tpu.matmul %0, %80, %cst_38 {dimension_numbers = #tpu.dot_dimension_numbers<[1], [0], [0], [1], [0, 0, 1, 1], [], []>} : vector<16x16xf32>, vector<16x32xf32>, vector<16x32xf32> -> vector<16x32xf32>
    %cst_39 = arith.constant dense<0.000000e+00> : vector<16x32xf32>
    %82 = tpu.matmul %81, %1, %cst_39 {dimension_numbers = #tpu.dot_dimension_numbers<[1], [0], [0], [1], [0, 0, 1, 1], [], []>} : vector<16x32xf32>, vector<32x32xf32>, vector<16x32xf32> -> vector<16x32xf32>
    %83 = arith.addf %82, %4 : vector<16x32xf32>
    %cst_40 = arith.constant 0.000000e+00 : f32
    %84 = vector.broadcast %cst_40 : f32 to vector<16x32xf32>
    %85 = arith.maximumf %83, %84 : vector<16x32xf32>
    %cst_41 = arith.constant 2.000000e+00 : f32
    %86 = vector.broadcast %cst_41 : f32 to vector<16x32xf32>
    %87 = arith.mulf %86, %85 : vector<16x32xf32>
    %88 = arith.addf %76, %87 : vector<16x32xf32>
    %89 = vector.broadcast %59 : f32 to vector<16x32xf32>
    %90 = arith.mulf %89, %85 : vector<16x32xf32>
    %91 = arith.addf %52, %90 : vector<16x32xf32>
    %cst_42 = arith.constant dense<0.000000e+00> : vector<16x32xf32>
    %92 = tpu.matmul %0, %91, %cst_42 {dimension_numbers = #tpu.dot_dimension_numbers<[1], [0], [0], [1], [0, 0, 1, 1], [], []>} : vector<16x16xf32>, vector<16x32xf32>, vector<16x32xf32> -> vector<16x32xf32>
    %cst_43 = arith.constant dense<0.000000e+00> : vector<16x32xf32>
    %93 = tpu.matmul %92, %1, %cst_43 {dimension_numbers = #tpu.dot_dimension_numbers<[1], [0], [0], [1], [0, 0, 1, 1], [], []>} : vector<16x32xf32>, vector<32x32xf32>, vector<16x32xf32> -> vector<16x32xf32>
    %94 = arith.addf %93, %4 : vector<16x32xf32>
    %cst_44 = arith.constant 0.000000e+00 : f32
    %95 = vector.broadcast %cst_44 : f32 to vector<16x32xf32>
    %96 = arith.maximumf %94, %95 : vector<16x32xf32>
    %97 = arith.addf %88, %96 : vector<16x32xf32>
    %cst_45 = arith.constant 6.000000e+00 : f32
    %98 = arith.divf %59, %cst_45 : f32
    %99 = vector.broadcast %98 : f32 to vector<16x32xf32>
    %100 = arith.mulf %99, %97 : vector<16x32xf32>
    %101 = arith.addf %52, %100 : vector<16x32xf32>
    %c1_i32_46 = arith.constant 1 : i32
    %102 = arith.addi %c1_i32_28, %c1_i32_46 : i32
    %103 = arith.index_cast %102 : i32 to index
    %c0_47 = arith.constant 0 : index
    %c0_48 = arith.constant 0 : index
    %104 = vector.load %arg5[%103, %c0_47, %c0_48] : memref<8x16x32xf32, #tpu.memory_space<vmem>>, vector<1x16x32xf32>
    %105 = vector.shape_cast %104 : vector<1x16x32xf32> to vector<16x32xf32>
    %106 = vector.shape_cast %101 : vector<16x32xf32> to vector<1x16x32xf32>
    tpu.vector_store %arg5[%103, %c0_47, %c0_48], %106 {strides = array<i32>} : memref<8x16x32xf32, #tpu.memory_space<vmem>>, vector<1x16x32xf32>,
    %c2_i32 = arith.constant 2 : i32
    %107 = arith.index_cast %c2_i32 : i32 to index
    %108 = memref.load %arg0[%107] : memref<7xf32, #tpu.memory_space<smem>>
    %cst_49 = arith.constant dense<0.000000e+00> : vector<16x32xf32>
    %109 = tpu.matmul %0, %101, %cst_49 {dimension_numbers = #tpu.dot_dimension_numbers<[1], [0], [0], [1], [0, 0, 1, 1], [], []>} : vector<16x16xf32>, vector<16x32xf32>, vector<16x32xf32> -> vector<16x32xf32>
    %cst_50 = arith.constant dense<0.000000e+00> : vector<16x32xf32>
    %110 = tpu.matmul %109, %1, %cst_50 {dimension_numbers = #tpu.dot_dimension_numbers<[1], [0], [0], [1], [0, 0, 1, 1], [], []>} : vector<16x32xf32>, vector<32x32xf32>, vector<16x32xf32> -> vector<16x32xf32>
    %111 = arith.addf %110, %4 : vector<16x32xf32>
    %cst_51 = arith.constant 0.000000e+00 : f32
    %112 = vector.broadcast %cst_51 : f32 to vector<16x32xf32>
    %113 = arith.maximumf %111, %112 : vector<16x32xf32>
    %cst_52 = arith.constant 5.000000e-01 : f32
    %114 = arith.mulf %cst_52, %108 : f32
    %115 = vector.broadcast %114 : f32 to vector<16x32xf32>
    %116 = arith.mulf %115, %113 : vector<16x32xf32>
    %117 = arith.addf %101, %116 : vector<16x32xf32>
    %cst_53 = arith.constant dense<0.000000e+00> : vector<16x32xf32>
    %118 = tpu.matmul %0, %117, %cst_53 {dimension_numbers = #tpu.dot_dimension_numbers<[1], [0], [0], [1], [0, 0, 1, 1], [], []>} : vector<16x16xf32>, vector<16x32xf32>, vector<16x32xf32> -> vector<16x32xf32>
    %cst_54 = arith.constant dense<0.000000e+00> : vector<16x32xf32>
    %119 = tpu.matmul %118, %1, %cst_54 {dimension_numbers = #tpu.dot_dimension_numbers<[1], [0], [0], [1], [0, 0, 1, 1], [], []>} : vector<16x32xf32>, vector<32x32xf32>, vector<16x32xf32> -> vector<16x32xf32>
    %120 = arith.addf %119, %4 : vector<16x32xf32>
    %cst_55 = arith.constant 0.000000e+00 : f32
    %121 = vector.broadcast %cst_55 : f32 to vector<16x32xf32>
    %122 = arith.maximumf %120, %121 : vector<16x32xf32>
    %cst_56 = arith.constant 2.000000e+00 : f32
    %123 = vector.broadcast %cst_56 : f32 to vector<16x32xf32>
    %124 = arith.mulf %123, %122 : vector<16x32xf32>
    %125 = arith.addf %113, %124 : vector<16x32xf32>
    %cst_57 = arith.constant 5.000000e-01 : f32
    %126 = arith.mulf %cst_57, %108 : f32
    %127 = vector.broadcast %126 : f32 to vector<16x32xf32>
    %128 = arith.mulf %127, %122 : vector<16x32xf32>
    %129 = arith.addf %101, %128 : vector<16x32xf32>
    %cst_58 = arith.constant dense<0.000000e+00> : vector<16x32xf32>
    %130 = tpu.matmul %0, %129, %cst_58 {dimension_numbers = #tpu.dot_dimension_numbers<[1], [0], [0], [1], [0, 0, 1, 1], [], []>} : vector<16x16xf32>, vector<16x32xf32>, vector<16x32xf32> -> vector<16x32xf32>
    %cst_59 = arith.constant dense<0.000000e+00> : vector<16x32xf32>
    %131 = tpu.matmul %130, %1, %cst_59 {dimension_numbers = #tpu.dot_dimension_numbers<[1], [0], [0], [1], [0, 0, 1, 1], [], []>} : vector<16x32xf32>, vector<32x32xf32>, vector<16x32xf32> -> vector<16x32xf32>
    %132 = arith.addf %131, %4 : vector<16x32xf32>
    %cst_60 = arith.constant 0.000000e+00 : f32
    %133 = vector.broadcast %cst_60 : f32 to vector<16x32xf32>
    %134 = arith.maximumf %132, %133 : vector<16x32xf32>
    %cst_61 = arith.constant 2.000000e+00 : f32
    %135 = vector.broadcast %cst_61 : f32 to vector<16x32xf32>
    %136 = arith.mulf %135, %134 : vector<16x32xf32>
    %137 = arith.addf %125, %136 : vector<16x32xf32>
    %138 = vector.broadcast %108 : f32 to vector<16x32xf32>
    %139 = arith.mulf %138, %134 : vector<16x32xf32>
    %140 = arith.addf %101, %139 : vector<16x32xf32>
    %cst_62 = arith.constant dense<0.000000e+00> : vector<16x32xf32>
    %141 = tpu.matmul %0, %140, %cst_62 {dimension_numbers = #tpu.dot_dimension_numbers<[1], [0], [0], [1], [0, 0, 1, 1], [], []>} : vector<16x16xf32>, vector<16x32xf32>, vector<16x32xf32> -> vector<16x32xf32>
    %cst_63 = arith.constant dense<0.000000e+00> : vector<16x32xf32>
    %142 = tpu.matmul %141, %1, %cst_63 {dimension_numbers = #tpu.dot_dimension_numbers<[1], [0], [0], [1], [0, 0, 1, 1], [], []>} : vector<16x32xf32>, vector<32x32xf32>, vector<16x32xf32> -> vector<16x32xf32>
    %143 = arith.addf %142, %4 : vector<16x32xf32>
    %cst_64 = arith.constant 0.000000e+00 : f32
    %144 = vector.broadcast %cst_64 : f32 to vector<16x32xf32>
    %145 = arith.maximumf %143, %144 : vector<16x32xf32>
    %146 = arith.addf %137, %145 : vector<16x32xf32>
    %cst_65 = arith.constant 6.000000e+00 : f32
    %147 = arith.divf %108, %cst_65 : f32
    %148 = vector.broadcast %147 : f32 to vector<16x32xf32>
    %149 = arith.mulf %148, %146 : vector<16x32xf32>
    %150 = arith.addf %101, %149 : vector<16x32xf32>
    %c1_i32_66 = arith.constant 1 : i32
    %151 = arith.addi %c2_i32, %c1_i32_66 : i32
    %152 = arith.index_cast %151 : i32 to index
    %c0_67 = arith.constant 0 : index
    %c0_68 = arith.constant 0 : index
    %153 = vector.load %arg5[%152, %c0_67, %c0_68] : memref<8x16x32xf32, #tpu.memory_space<vmem>>, vector<1x16x32xf32>
    %154 = vector.shape_cast %153 : vector<1x16x32xf32> to vector<16x32xf32>
    %155 = vector.shape_cast %150 : vector<16x32xf32> to vector<1x16x32xf32>
    tpu.vector_store %arg5[%152, %c0_67, %c0_68], %155 {strides = array<i32>} : memref<8x16x32xf32, #tpu.memory_space<vmem>>, vector<1x16x32xf32>,
    %c3_i32 = arith.constant 3 : i32
    %156 = arith.index_cast %c3_i32 : i32 to index
    %157 = memref.load %arg0[%156] : memref<7xf32, #tpu.memory_space<smem>>
    %cst_69 = arith.constant dense<0.000000e+00> : vector<16x32xf32>
    %158 = tpu.matmul %0, %150, %cst_69 {dimension_numbers = #tpu.dot_dimension_numbers<[1], [0], [0], [1], [0, 0, 1, 1], [], []>} : vector<16x16xf32>, vector<16x32xf32>, vector<16x32xf32> -> vector<16x32xf32>
    %cst_70 = arith.constant dense<0.000000e+00> : vector<16x32xf32>
    %159 = tpu.matmul %158, %1, %cst_70 {dimension_numbers = #tpu.dot_dimension_numbers<[1], [0], [0], [1], [0, 0, 1, 1], [], []>} : vector<16x32xf32>, vector<32x32xf32>, vector<16x32xf32> -> vector<16x32xf32>
    %160 = arith.addf %159, %4 : vector<16x32xf32>
    %cst_71 = arith.constant 0.000000e+00 : f32
    %161 = vector.broadcast %cst_71 : f32 to vector<16x32xf32>
    %162 = arith.maximumf %160, %161 : vector<16x32xf32>
    %cst_72 = arith.constant 5.000000e-01 : f32
    %163 = arith.mulf %cst_72, %157 : f32
    %164 = vector.broadcast %163 : f32 to vector<16x32xf32>
    %165 = arith.mulf %164, %162 : vector<16x32xf32>
    %166 = arith.addf %150, %165 : vector<16x32xf32>
    %cst_73 = arith.constant dense<0.000000e+00> : vector<16x32xf32>
    %167 = tpu.matmul %0, %166, %cst_73 {dimension_numbers = #tpu.dot_dimension_numbers<[1], [0], [0], [1], [0, 0, 1, 1], [], []>} : vector<16x16xf32>, vector<16x32xf32>, vector<16x32xf32> -> vector<16x32xf32>
    %cst_74 = arith.constant dense<0.000000e+00> : vector<16x32xf32>
    %168 = tpu.matmul %167, %1, %cst_74 {dimension_numbers = #tpu.dot_dimension_numbers<[1], [0], [0], [1], [0, 0, 1, 1], [], []>} : vector<16x32xf32>, vector<32x32xf32>, vector<16x32xf32> -> vector<16x32xf32>
    %169 = arith.addf %168, %4 : vector<16x32xf32>
    %cst_75 = arith.constant 0.000000e+00 : f32
    %170 = vector.broadcast %cst_75 : f32 to vector<16x32xf32>
    %171 = arith.maximumf %169, %170 : vector<16x32xf32>
    %cst_76 = arith.constant 2.000000e+00 : f32
    %172 = vector.broadcast %cst_76 : f32 to vector<16x32xf32>
    %173 = arith.mulf %172, %171 : vector<16x32xf32>
    %174 = arith.addf %162, %173 : vector<16x32xf32>
    %cst_77 = arith.constant 5.000000e-01 : f32
    %175 = arith.mulf %cst_77, %157 : f32
    %176 = vector.broadcast %175 : f32 to vector<16x32xf32>
    %177 = arith.mulf %176, %171 : vector<16x32xf32>
    %178 = arith.addf %150, %177 : vector<16x32xf32>
    %cst_78 = arith.constant dense<0.000000e+00> : vector<16x32xf32>
    %179 = tpu.matmul %0, %178, %cst_78 {dimension_numbers = #tpu.dot_dimension_numbers<[1], [0], [0], [1], [0, 0, 1, 1], [], []>} : vector<16x16xf32>, vector<16x32xf32>, vector<16x32xf32> -> vector<16x32xf32>
    %cst_79 = arith.constant dense<0.000000e+00> : vector<16x32xf32>
    %180 = tpu.matmul %179, %1, %cst_79 {dimension_numbers = #tpu.dot_dimension_numbers<[1], [0], [0], [1], [0, 0, 1, 1], [], []>} : vector<16x32xf32>, vector<32x32xf32>, vector<16x32xf32> -> vector<16x32xf32>
    %181 = arith.addf %180, %4 : vector<16x32xf32>
    %cst_80 = arith.constant 0.000000e+00 : f32
    %182 = vector.broadcast %cst_80 : f32 to vector<16x32xf32>
    %183 = arith.maximumf %181, %182 : vector<16x32xf32>
    %cst_81 = arith.constant 2.000000e+00 : f32
    %184 = vector.broadcast %cst_81 : f32 to vector<16x32xf32>
    %185 = arith.mulf %184, %183 : vector<16x32xf32>
    %186 = arith.addf %174, %185 : vector<16x32xf32>
    %187 = vector.broadcast %157 : f32 to vector<16x32xf32>
    %188 = arith.mulf %187, %183 : vector<16x32xf32>
    %189 = arith.addf %150, %188 : vector<16x32xf32>
    %cst_82 = arith.constant dense<0.000000e+00> : vector<16x32xf32>
    %190 = tpu.matmul %0, %189, %cst_82 {dimension_numbers = #tpu.dot_dimension_numbers<[1], [0], [0], [1], [0, 0, 1, 1], [], []>} : vector<16x16xf32>, vector<16x32xf32>, vector<16x32xf32> -> vector<16x32xf32>
    %cst_83 = arith.constant dense<0.000000e+00> : vector<16x32xf32>
    %191 = tpu.matmul %190, %1, %cst_83 {dimension_numbers = #tpu.dot_dimension_numbers<[1], [0], [0], [1], [0, 0, 1, 1], [], []>} : vector<16x32xf32>, vector<32x32xf32>, vector<16x32xf32> -> vector<16x32xf32>
    %192 = arith.addf %191, %4 : vector<16x32xf32>
    %cst_84 = arith.constant 0.000000e+00 : f32
    %193 = vector.broadcast %cst_84 : f32 to vector<16x32xf32>
    %194 = arith.maximumf %192, %193 : vector<16x32xf32>
    %195 = arith.addf %186, %194 : vector<16x32xf32>
    %cst_85 = arith.constant 6.000000e+00 : f32
    %196 = arith.divf %157, %cst_85 : f32
    %197 = vector.broadcast %196 : f32 to vector<16x32xf32>
    %198 = arith.mulf %197, %195 : vector<16x32xf32>
    %199 = arith.addf %150, %198 : vector<16x32xf32>
    %c1_i32_86 = arith.constant 1 : i32
    %200 = arith.addi %c3_i32, %c1_i32_86 : i32
    %201 = arith.index_cast %200 : i32 to index
    %c0_87 = arith.constant 0 : index
    %c0_88 = arith.constant 0 : index
    %202 = vector.load %arg5[%201, %c0_87, %c0_88] : memref<8x16x32xf32, #tpu.memory_space<vmem>>, vector<1x16x32xf32>
    %203 = vector.shape_cast %202 : vector<1x16x32xf32> to vector<16x32xf32>
    %204 = vector.shape_cast %199 : vector<16x32xf32> to vector<1x16x32xf32>
    tpu.vector_store %arg5[%201, %c0_87, %c0_88], %204 {strides = array<i32>} : memref<8x16x32xf32, #tpu.memory_space<vmem>>, vector<1x16x32xf32>,
    %c4_i32 = arith.constant 4 : i32
    %205 = arith.index_cast %c4_i32 : i32 to index
    %206 = memref.load %arg0[%205] : memref<7xf32, #tpu.memory_space<smem>>
    %cst_89 = arith.constant dense<0.000000e+00> : vector<16x32xf32>
    %207 = tpu.matmul %0, %199, %cst_89 {dimension_numbers = #tpu.dot_dimension_numbers<[1], [0], [0], [1], [0, 0, 1, 1], [], []>} : vector<16x16xf32>, vector<16x32xf32>, vector<16x32xf32> -> vector<16x32xf32>
    %cst_90 = arith.constant dense<0.000000e+00> : vector<16x32xf32>
    %208 = tpu.matmul %207, %1, %cst_90 {dimension_numbers = #tpu.dot_dimension_numbers<[1], [0], [0], [1], [0, 0, 1, 1], [], []>} : vector<16x32xf32>, vector<32x32xf32>, vector<16x32xf32> -> vector<16x32xf32>
    %209 = arith.addf %208, %4 : vector<16x32xf32>
    %cst_91 = arith.constant 0.000000e+00 : f32
    %210 = vector.broadcast %cst_91 : f32 to vector<16x32xf32>
    %211 = arith.maximumf %209, %210 : vector<16x32xf32>
    %cst_92 = arith.constant 5.000000e-01 : f32
    %212 = arith.mulf %cst_92, %206 : f32
    %213 = vector.broadcast %212 : f32 to vector<16x32xf32>
    %214 = arith.mulf %213, %211 : vector<16x32xf32>
    %215 = arith.addf %199, %214 : vector<16x32xf32>
    %cst_93 = arith.constant dense<0.000000e+00> : vector<16x32xf32>
    %216 = tpu.matmul %0, %215, %cst_93 {dimension_numbers = #tpu.dot_dimension_numbers<[1], [0], [0], [1], [0, 0, 1, 1], [], []>} : vector<16x16xf32>, vector<16x32xf32>, vector<16x32xf32> -> vector<16x32xf32>
    %cst_94 = arith.constant dense<0.000000e+00> : vector<16x32xf32>
    %217 = tpu.matmul %216, %1, %cst_94 {dimension_numbers = #tpu.dot_dimension_numbers<[1], [0], [0], [1], [0, 0, 1, 1], [], []>} : vector<16x32xf32>, vector<32x32xf32>, vector<16x32xf32> -> vector<16x32xf32>
    %218 = arith.addf %217, %4 : vector<16x32xf32>
    %cst_95 = arith.constant 0.000000e+00 : f32
    %219 = vector.broadcast %cst_95 : f32 to vector<16x32xf32>
    %220 = arith.maximumf %218, %219 : vector<16x32xf32>
    %cst_96 = arith.constant 2.000000e+00 : f32
    %221 = vector.broadcast %cst_96 : f32 to vector<16x32xf32>
    %222 = arith.mulf %221, %220 : vector<16x32xf32>
    %223 = arith.addf %211, %222 : vector<16x32xf32>
    %cst_97 = arith.constant 5.000000e-01 : f32
    %224 = arith.mulf %cst_97, %206 : f32
    %225 = vector.broadcast %224 : f32 to vector<16x32xf32>
    %226 = arith.mulf %225, %220 : vector<16x32xf32>
    %227 = arith.addf %199, %226 : vector<16x32xf32>
    %cst_98 = arith.constant dense<0.000000e+00> : vector<16x32xf32>
    %228 = tpu.matmul %0, %227, %cst_98 {dimension_numbers = #tpu.dot_dimension_numbers<[1], [0], [0], [1], [0, 0, 1, 1], [], []>} : vector<16x16xf32>, vector<16x32xf32>, vector<16x32xf32> -> vector<16x32xf32>
    %cst_99 = arith.constant dense<0.000000e+00> : vector<16x32xf32>
    %229 = tpu.matmul %228, %1, %cst_99 {dimension_numbers = #tpu.dot_dimension_numbers<[1], [0], [0], [1], [0, 0, 1, 1], [], []>} : vector<16x32xf32>, vector<32x32xf32>, vector<16x32xf32> -> vector<16x32xf32>
    %230 = arith.addf %229, %4 : vector<16x32xf32>
    %cst_100 = arith.constant 0.000000e+00 : f32
    %231 = vector.broadcast %cst_100 : f32 to vector<16x32xf32>
    %232 = arith.maximumf %230, %231 : vector<16x32xf32>
    %cst_101 = arith.constant 2.000000e+00 : f32
    %233 = vector.broadcast %cst_101 : f32 to vector<16x32xf32>
    %234 = arith.mulf %233, %232 : vector<16x32xf32>
    %235 = arith.addf %223, %234 : vector<16x32xf32>
    %236 = vector.broadcast %206 : f32 to vector<16x32xf32>
    %237 = arith.mulf %236, %232 : vector<16x32xf32>
    %238 = arith.addf %199, %237 : vector<16x32xf32>
    %cst_102 = arith.constant dense<0.000000e+00> : vector<16x32xf32>
    %239 = tpu.matmul %0, %238, %cst_102 {dimension_numbers = #tpu.dot_dimension_numbers<[1], [0], [0], [1], [0, 0, 1, 1], [], []>} : vector<16x16xf32>, vector<16x32xf32>, vector<16x32xf32> -> vector<16x32xf32>
    %cst_103 = arith.constant dense<0.000000e+00> : vector<16x32xf32>
    %240 = tpu.matmul %239, %1, %cst_103 {dimension_numbers = #tpu.dot_dimension_numbers<[1], [0], [0], [1], [0, 0, 1, 1], [], []>} : vector<16x32xf32>, vector<32x32xf32>, vector<16x32xf32> -> vector<16x32xf32>
    %241 = arith.addf %240, %4 : vector<16x32xf32>
    %cst_104 = arith.constant 0.000000e+00 : f32
    %242 = vector.broadcast %cst_104 : f32 to vector<16x32xf32>
    %243 = arith.maximumf %241, %242 : vector<16x32xf32>
    %244 = arith.addf %235, %243 : vector<16x32xf32>
    %cst_105 = arith.constant 6.000000e+00 : f32
    %245 = arith.divf %206, %cst_105 : f32
    %246 = vector.broadcast %245 : f32 to vector<16x32xf32>
    %247 = arith.mulf %246, %244 : vector<16x32xf32>
    %248 = arith.addf %199, %247 : vector<16x32xf32>
    %c1_i32_106 = arith.constant 1 : i32
    %249 = arith.addi %c4_i32, %c1_i32_106 : i32
    %250 = arith.index_cast %249 : i32 to index
    %c0_107 = arith.constant 0 : index
    %c0_108 = arith.constant 0 : index
    %251 = vector.load %arg5[%250, %c0_107, %c0_108] : memref<8x16x32xf32, #tpu.memory_space<vmem>>, vector<1x16x32xf32>
    %252 = vector.shape_cast %251 : vector<1x16x32xf32> to vector<16x32xf32>
    %253 = vector.shape_cast %248 : vector<16x32xf32> to vector<1x16x32xf32>
    tpu.vector_store %arg5[%250, %c0_107, %c0_108], %253 {strides = array<i32>} : memref<8x16x32xf32, #tpu.memory_space<vmem>>, vector<1x16x32xf32>,
    %c5_i32 = arith.constant 5 : i32
    %254 = arith.index_cast %c5_i32 : i32 to index
    %255 = memref.load %arg0[%254] : memref<7xf32, #tpu.memory_space<smem>>
    %cst_109 = arith.constant dense<0.000000e+00> : vector<16x32xf32>
    %256 = tpu.matmul %0, %248, %cst_109 {dimension_numbers = #tpu.dot_dimension_numbers<[1], [0], [0], [1], [0, 0, 1, 1], [], []>} : vector<16x16xf32>, vector<16x32xf32>, vector<16x32xf32> -> vector<16x32xf32>
    %cst_110 = arith.constant dense<0.000000e+00> : vector<16x32xf32>
    %257 = tpu.matmul %256, %1, %cst_110 {dimension_numbers = #tpu.dot_dimension_numbers<[1], [0], [0], [1], [0, 0, 1, 1], [], []>} : vector<16x32xf32>, vector<32x32xf32>, vector<16x32xf32> -> vector<16x32xf32>
    %258 = arith.addf %257, %4 : vector<16x32xf32>
    %cst_111 = arith.constant 0.000000e+00 : f32
    %259 = vector.broadcast %cst_111 : f32 to vector<16x32xf32>
    %260 = arith.maximumf %258, %259 : vector<16x32xf32>
    %cst_112 = arith.constant 5.000000e-01 : f32
    %261 = arith.mulf %cst_112, %255 : f32
    %262 = vector.broadcast %261 : f32 to vector<16x32xf32>
    %263 = arith.mulf %262, %260 : vector<16x32xf32>
    %264 = arith.addf %248, %263 : vector<16x32xf32>
    %cst_113 = arith.constant dense<0.000000e+00> : vector<16x32xf32>
    %265 = tpu.matmul %0, %264, %cst_113 {dimension_numbers = #tpu.dot_dimension_numbers<[1], [0], [0], [1], [0, 0, 1, 1], [], []>} : vector<16x16xf32>, vector<16x32xf32>, vector<16x32xf32> -> vector<16x32xf32>
    %cst_114 = arith.constant dense<0.000000e+00> : vector<16x32xf32>
    %266 = tpu.matmul %265, %1, %cst_114 {dimension_numbers = #tpu.dot_dimension_numbers<[1], [0], [0], [1], [0, 0, 1, 1], [], []>} : vector<16x32xf32>, vector<32x32xf32>, vector<16x32xf32> -> vector<16x32xf32>
    %267 = arith.addf %266, %4 : vector<16x32xf32>
    %cst_115 = arith.constant 0.000000e+00 : f32
    %268 = vector.broadcast %cst_115 : f32 to vector<16x32xf32>
    %269 = arith.maximumf %267, %268 : vector<16x32xf32>
    %cst_116 = arith.constant 2.000000e+00 : f32
    %270 = vector.broadcast %cst_116 : f32 to vector<16x32xf32>
    %271 = arith.mulf %270, %269 : vector<16x32xf32>
    %272 = arith.addf %260, %271 : vector<16x32xf32>
    %cst_117 = arith.constant 5.000000e-01 : f32
    %273 = arith.mulf %cst_117, %255 : f32
    %274 = vector.broadcast %273 : f32 to vector<16x32xf32>
    %275 = arith.mulf %274, %269 : vector<16x32xf32>
    %276 = arith.addf %248, %275 : vector<16x32xf32>
    %cst_118 = arith.constant dense<0.000000e+00> : vector<16x32xf32>
    %277 = tpu.matmul %0, %276, %cst_118 {dimension_numbers = #tpu.dot_dimension_numbers<[1], [0], [0], [1], [0, 0, 1, 1], [], []>} : vector<16x16xf32>, vector<16x32xf32>, vector<16x32xf32> -> vector<16x32xf32>
    %cst_119 = arith.constant dense<0.000000e+00> : vector<16x32xf32>
    %278 = tpu.matmul %277, %1, %cst_119 {dimension_numbers = #tpu.dot_dimension_numbers<[1], [0], [0], [1], [0, 0, 1, 1], [], []>} : vector<16x32xf32>, vector<32x32xf32>, vector<16x32xf32> -> vector<16x32xf32>
    %279 = arith.addf %278, %4 : vector<16x32xf32>
    %cst_120 = arith.constant 0.000000e+00 : f32
    %280 = vector.broadcast %cst_120 : f32 to vector<16x32xf32>
    %281 = arith.maximumf %279, %280 : vector<16x32xf32>
    %cst_121 = arith.constant 2.000000e+00 : f32
    %282 = vector.broadcast %cst_121 : f32 to vector<16x32xf32>
    %283 = arith.mulf %282, %281 : vector<16x32xf32>
    %284 = arith.addf %272, %283 : vector<16x32xf32>
    %285 = vector.broadcast %255 : f32 to vector<16x32xf32>
    %286 = arith.mulf %285, %281 : vector<16x32xf32>
    %287 = arith.addf %248, %286 : vector<16x32xf32>
    %cst_122 = arith.constant dense<0.000000e+00> : vector<16x32xf32>
    %288 = tpu.matmul %0, %287, %cst_122 {dimension_numbers = #tpu.dot_dimension_numbers<[1], [0], [0], [1], [0, 0, 1, 1], [], []>} : vector<16x16xf32>, vector<16x32xf32>, vector<16x32xf32> -> vector<16x32xf32>
    %cst_123 = arith.constant dense<0.000000e+00> : vector<16x32xf32>
    %289 = tpu.matmul %288, %1, %cst_123 {dimension_numbers = #tpu.dot_dimension_numbers<[1], [0], [0], [1], [0, 0, 1, 1], [], []>} : vector<16x32xf32>, vector<32x32xf32>, vector<16x32xf32> -> vector<16x32xf32>
    %290 = arith.addf %289, %4 : vector<16x32xf32>
    %cst_124 = arith.constant 0.000000e+00 : f32
    %291 = vector.broadcast %cst_124 : f32 to vector<16x32xf32>
    %292 = arith.maximumf %290, %291 : vector<16x32xf32>
    %293 = arith.addf %284, %292 : vector<16x32xf32>
    %cst_125 = arith.constant 6.000000e+00 : f32
    %294 = arith.divf %255, %cst_125 : f32
    %295 = vector.broadcast %294 : f32 to vector<16x32xf32>
    %296 = arith.mulf %295, %293 : vector<16x32xf32>
    %297 = arith.addf %248, %296 : vector<16x32xf32>
    %c1_i32_126 = arith.constant 1 : i32
    %298 = arith.addi %c5_i32, %c1_i32_126 : i32
    %299 = arith.index_cast %298 : i32 to index
    %c0_127 = arith.constant 0 : index
    %c0_128 = arith.constant 0 : index
    %300 = vector.load %arg5[%299, %c0_127, %c0_128] : memref<8x16x32xf32, #tpu.memory_space<vmem>>, vector<1x16x32xf32>
    %301 = vector.shape_cast %300 : vector<1x16x32xf32> to vector<16x32xf32>
    %302 = vector.shape_cast %297 : vector<16x32xf32> to vector<1x16x32xf32>
    tpu.vector_store %arg5[%299, %c0_127, %c0_128], %302 {strides = array<i32>} : memref<8x16x32xf32, #tpu.memory_space<vmem>>, vector<1x16x32xf32>,
    %c6_i32 = arith.constant 6 : i32
    %303 = arith.index_cast %c6_i32 : i32 to index
    %304 = memref.load %arg0[%303] : memref<7xf32, #tpu.memory_space<smem>>
    %cst_129 = arith.constant dense<0.000000e+00> : vector<16x32xf32>
    %305 = tpu.matmul %0, %297, %cst_129 {dimension_numbers = #tpu.dot_dimension_numbers<[1], [0], [0], [1], [0, 0, 1, 1], [], []>} : vector<16x16xf32>, vector<16x32xf32>, vector<16x32xf32> -> vector<16x32xf32>
    %cst_130 = arith.constant dense<0.000000e+00> : vector<16x32xf32>
    %306 = tpu.matmul %305, %1, %cst_130 {dimension_numbers = #tpu.dot_dimension_numbers<[1], [0], [0], [1], [0, 0, 1, 1], [], []>} : vector<16x32xf32>, vector<32x32xf32>, vector<16x32xf32> -> vector<16x32xf32>
    %307 = arith.addf %306, %4 : vector<16x32xf32>
    %cst_131 = arith.constant 0.000000e+00 : f32
    %308 = vector.broadcast %cst_131 : f32 to vector<16x32xf32>
    %309 = arith.maximumf %307, %308 : vector<16x32xf32>
    %cst_132 = arith.constant 5.000000e-01 : f32
    %310 = arith.mulf %cst_132, %304 : f32
    %311 = vector.broadcast %310 : f32 to vector<16x32xf32>
    %312 = arith.mulf %311, %309 : vector<16x32xf32>
    %313 = arith.addf %297, %312 : vector<16x32xf32>
    %cst_133 = arith.constant dense<0.000000e+00> : vector<16x32xf32>
    %314 = tpu.matmul %0, %313, %cst_133 {dimension_numbers = #tpu.dot_dimension_numbers<[1], [0], [0], [1], [0, 0, 1, 1], [], []>} : vector<16x16xf32>, vector<16x32xf32>, vector<16x32xf32> -> vector<16x32xf32>
    %cst_134 = arith.constant dense<0.000000e+00> : vector<16x32xf32>
    %315 = tpu.matmul %314, %1, %cst_134 {dimension_numbers = #tpu.dot_dimension_numbers<[1], [0], [0], [1], [0, 0, 1, 1], [], []>} : vector<16x32xf32>, vector<32x32xf32>, vector<16x32xf32> -> vector<16x32xf32>
    %316 = arith.addf %315, %4 : vector<16x32xf32>
    %cst_135 = arith.constant 0.000000e+00 : f32
    %317 = vector.broadcast %cst_135 : f32 to vector<16x32xf32>
    %318 = arith.maximumf %316, %317 : vector<16x32xf32>
    %cst_136 = arith.constant 2.000000e+00 : f32
    %319 = vector.broadcast %cst_136 : f32 to vector<16x32xf32>
    %320 = arith.mulf %319, %318 : vector<16x32xf32>
    %321 = arith.addf %309, %320 : vector<16x32xf32>
    %cst_137 = arith.constant 5.000000e-01 : f32
    %322 = arith.mulf %cst_137, %304 : f32
    %323 = vector.broadcast %322 : f32 to vector<16x32xf32>
    %324 = arith.mulf %323, %318 : vector<16x32xf32>
    %325 = arith.addf %297, %324 : vector<16x32xf32>
    %cst_138 = arith.constant dense<0.000000e+00> : vector<16x32xf32>
    %326 = tpu.matmul %0, %325, %cst_138 {dimension_numbers = #tpu.dot_dimension_numbers<[1], [0], [0], [1], [0, 0, 1, 1], [], []>} : vector<16x16xf32>, vector<16x32xf32>, vector<16x32xf32> -> vector<16x32xf32>
    %cst_139 = arith.constant dense<0.000000e+00> : vector<16x32xf32>
    %327 = tpu.matmul %326, %1, %cst_139 {dimension_numbers = #tpu.dot_dimension_numbers<[1], [0], [0], [1], [0, 0, 1, 1], [], []>} : vector<16x32xf32>, vector<32x32xf32>, vector<16x32xf32> -> vector<16x32xf32>
    %328 = arith.addf %327, %4 : vector<16x32xf32>
    %cst_140 = arith.constant 0.000000e+00 : f32
    %329 = vector.broadcast %cst_140 : f32 to vector<16x32xf32>
    %330 = arith.maximumf %328, %329 : vector<16x32xf32>
    %cst_141 = arith.constant 2.000000e+00 : f32
    %331 = vector.broadcast %cst_141 : f32 to vector<16x32xf32>
    %332 = arith.mulf %331, %330 : vector<16x32xf32>
    %333 = arith.addf %321, %332 : vector<16x32xf32>
    %334 = vector.broadcast %304 : f32 to vector<16x32xf32>
    %335 = arith.mulf %334, %330 : vector<16x32xf32>
    %336 = arith.addf %297, %335 : vector<16x32xf32>
    %cst_142 = arith.constant dense<0.000000e+00> : vector<16x32xf32>
    %337 = tpu.matmul %0, %336, %cst_142 {dimension_numbers = #tpu.dot_dimension_numbers<[1], [0], [0], [1], [0, 0, 1, 1], [], []>} : vector<16x16xf32>, vector<16x32xf32>, vector<16x32xf32> -> vector<16x32xf32>
    %cst_143 = arith.constant dense<0.000000e+00> : vector<16x32xf32>
    %338 = tpu.matmul %337, %1, %cst_143 {dimension_numbers = #tpu.dot_dimension_numbers<[1], [0], [0], [1], [0, 0, 1, 1], [], []>} : vector<16x32xf32>, vector<32x32xf32>, vector<16x32xf32> -> vector<16x32xf32>
    %339 = arith.addf %338, %4 : vector<16x32xf32>
    %cst_144 = arith.constant 0.000000e+00 : f32
    %340 = vector.broadcast %cst_144 : f32 to vector<16x32xf32>
    %341 = arith.maximumf %339, %340 : vector<16x32xf32>
    %342 = arith.addf %333, %341 : vector<16x32xf32>
    %cst_145 = arith.constant 6.000000e+00 : f32
    %343 = arith.divf %304, %cst_145 : f32
    %344 = vector.broadcast %343 : f32 to vector<16x32xf32>
    %345 = arith.mulf %344, %342 : vector<16x32xf32>
    %346 = arith.addf %297, %345 : vector<16x32xf32>
    %c1_i32_146 = arith.constant 1 : i32
    %347 = arith.addi %c6_i32, %c1_i32_146 : i32
    %348 = arith.index_cast %347 : i32 to index
    %c0_147 = arith.constant 0 : index
    %c0_148 = arith.constant 0 : index
    %349 = vector.load %arg5[%348, %c0_147, %c0_148] : memref<8x16x32xf32, #tpu.memory_space<vmem>>, vector<1x16x32xf32>
    %350 = vector.shape_cast %349 : vector<1x16x32xf32> to vector<16x32xf32>
    %351 = vector.shape_cast %346 : vector<16x32xf32> to vector<1x16x32xf32>
    tpu.vector_store %arg5[%348, %c0_147, %c0_148], %351 {strides = array<i32>} : memref<8x16x32xf32, #tpu.memory_space<vmem>>, vector<1x16x32xf32>,
    %c7_i32 = arith.constant 7 : i32
    return
  }
}

</mosaic_0001>

<bundles_post_ra>
// kernel: ode_block2_forward.1
= control target key start
LH: loop header
LB: loop body
LE: loop exit
PB: predicated region body
PF: predicated region fallthrough
CT: control target
= control target key end

     0   :  { %10 = vsyncpa [#allocation5], 0  ;;  %s6830_s0 = inlined_call_operand.hbm [shape: f32[7], index: 0, kind: input, shape index: {}]   ;;  %s6831_s1 = inlined_call_operand.hbm [shape: f32[16,32], index: 1, kind: input, shape index: {}]   ;;  %s6832_s2 = inlined_call_operand.hbm [shape: f32[16,16], index: 2, kind: input, shape index: {}]   ;;  %s6833_s3 = inlined_call_operand.hbm [shape: f32[32,32], index: 3, kind: input, shape index: {}]   ;;  %s6834_s4 = inlined_call_operand.hbm [shape: f32[1,32], index: 4, kind: input, shape index: {}]   ;;  %s6835_s5 = inlined_call_operand.hbm [shape: f32[8,16,32], index: 5, kind: output, shape index: {}]  }
   0x1   :  { %11 = vsyncpa [#allocation3], 0 }
   0x2   :  { %12 = vsyncpa [#allocation8], 0 }
   0x3   :  { %13 = vsyncpa [#allocation11], 0 }
   0x4   :  { %14 = vsyncpa [#allocation4], 0  ;;  %s6193_s18 = smov [#allocation7]   ;;  %s6194_s20 = smov [#allocation6]  }
   0x5   :  { %s40_s19 = sshll.u32 %s6193_s18, 4  ;;  %s28_s21 = sshll.u32 %s6194_s20, 4  ;;  %s41_s19 = int_to_ptr.vmem [resolvable:$true] %s40_s19  ;;  %s29_s21 = int_to_ptr.vmem [resolvable:$true] %s28_s21 }
   0x6   :  { %s6063_s24 = scalar_lea.hbm %s6832_s2, 256 }
   0x7   :  { %p6064_p0 = scmp.ne.s32.totalorder %s6832_s2, %s6063_s24  ;;  %p6067_p1 = scmp.lt.u32.totalorder %s6063_s24, %s6832_s2 }
   0x9   :  { %p6069_p2 = pnand %p6067_p1, %p6064_p0 }
   0xb   :  { %6072 = shalt.err (!%p6069_p2)
}
   0xc   :  { %s6073_s29 = scalar_lea.vmem %s41_s19, 256  ;;  %p6078_p4 = scmp.lt.s32.totalorder %s41_s19, %s41_s19 }
   0xd   :  { %p6074_p3 = scmp.ne.s32.totalorder %s41_s19, %s6073_s29  ;;  %p6079_p5 = scmp.lt.s32.totalorder %s6073_s29, %s6073_s29 }
   0xf   :  { %p6080_p6 = por %p6079_p5, %p6078_p4 }
  0x11   :  { %p6081_p7 = pnand %p6080_p6, %p6074_p3 }
  0x13   :  { %6084 = shalt.err (!%p6081_p7)
}
  0x14   :  { %s6195_s30 = smov 128   ;;  %s6196_s6 = smov 8  }
  0x15   :  { %46 = dma.hbm_to_vmem [thread:$0]  %s6832_s2, 256, %s41_s19, [#allocation8], %s6195_s30, %s6195_s30, %s6196_s6  }
  0x16   :  { %s6085_s11 = scalar_lea.hbm %s6830_s0, 16 }
  0x17   :  { %p6086_p8 = scmp.ne.s32.totalorder %s6830_s0, %s6085_s11  ;;  %p6089_p9 = scmp.lt.u32.totalorder %s6085_s11, %s6830_s0 }
  0x19   :  { %p6091_p10 = pnand %p6089_p9, %p6086_p8 }
  0x1b   :  { %6094 = shalt.err (!%p6091_p10)
}
  0x1c   :  { %s6197_s16 = smov [#allocation2]   ;;  %s6095_s20 = scalar_lea.hbm %s6831_s1, 256 }
  0x1d   :  { %22 = dma.hbm_to_smem %s6830_s0, 16, %s6197_s16, [#allocation5]  }
  0x1e   :  { %p6096_p11 = scmp.ne.s32.totalorder %s6831_s1, %s6095_s20  ;;  %p6099_p12 = scmp.lt.u32.totalorder %s6095_s20, %s6831_s1 }
  0x20   :  { %p6101_p13 = pnand %p6099_p12, %p6096_p11 }
  0x22   :  { %6104 = shalt.err (!%p6101_p13)
}
  0x23   :  { %s6105_s26 = scalar_lea.vmem %s29_s21, 256  ;;  %p6110_p1 = scmp.lt.s32.totalorder %s29_s21, %s29_s21 }
  0x24   :  { %p6106_p0 = scmp.ne.s32.totalorder %s29_s21, %s6105_s26  ;;  %p6111_p2 = scmp.lt.s32.totalorder %s6105_s26, %s6105_s26 }
  0x26   :  { %p6112_p3 = por %p6111_p2, %p6110_p1 }
  0x28   :  { %p6113_p4 = pnand %p6112_p3, %p6106_p0 }
  0x2a   :  { %6116 = shalt.err (!%p6113_p4)
}
  0x2b   :  { %34 = dma.hbm_to_vmem [thread:$0]  %s6831_s1, 256, %s29_s21, [#allocation3], %s6195_s30, %s6195_s30, %s6196_s6  }
  0x2c   :  { %s6198_s28 = smov [#allocation9]   ;;  %s6199_s7 = smov [#allocation10]  }
  0x2d   :  { %s52_s29 = sshll.u32 %s6198_s28, 4  ;;  %s65_s8 = sshll.u32 %s6199_s7, 4  ;;  %s53_s29 = int_to_ptr.vmem [resolvable:$true] %s52_s29  ;;  %s66_s8 = int_to_ptr.vmem [resolvable:$true] %s65_s8 }
  0x2e   :  { %s6117_s11 = scalar_lea.hbm %s6833_s3, 512 }
  0x2f   :  { %p6118_p5 = scmp.ne.s32.totalorder %s6833_s3, %s6117_s11  ;;  %p6121_p6 = scmp.lt.u32.totalorder %s6117_s11, %s6833_s3 }
  0x31   :  { %p6123_p7 = pnand %p6121_p6, %p6118_p5 }
  0x33   :  { %6126 = shalt.err (!%p6123_p7)
}
  0x34   :  { %s6127_s1 = scalar_lea.vmem %s53_s29, 512  ;;  %p6132_p9 = scmp.lt.s32.totalorder %s53_s29, %s53_s29 }
  0x35   :  { %p6128_p8 = scmp.ne.s32.totalorder %s53_s29, %s6127_s1  ;;  %p6133_p10 = scmp.lt.s32.totalorder %s6127_s1, %s6127_s1 }
  0x37   :  { %p6134_p11 = por %p6133_p10, %p6132_p9 }
  0x39   :  { %p6135_p12 = pnand %p6134_p11, %p6128_p8 }
  0x3b   :  { %6138 = shalt.err (!%p6135_p12)
}
  0x3c   :  { %58 = dma.hbm_to_vmem [thread:$0]  %s6833_s3, 512, %s53_s29, [#allocation8], %s6195_s30, %s6195_s30, %s6196_s6  }
  0x3d   :  { %s6139_s2 = scalar_lea.hbm %s6834_s4, 16 }
  0x3e   :  { %p6140_p13 = scmp.ne.s32.totalorder %s6834_s4, %s6139_s2  ;;  %p6143_p0 = scmp.lt.u32.totalorder %s6139_s2, %s6834_s4 }
  0x40   :  { %p6145_p1 = pnand %p6143_p0, %p6140_p13 }
  0x42   :  { %6148 = shalt.err (!%p6145_p1)
}
  0x43   :  { %s6149_s24 = scalar_lea.vmem %s66_s8, 16  ;;  %s6153_s25 = scalar_lea.vmem %s66_s8, 32 }
  0x44   :  { %p6150_p2 = scmp.ne.s32.totalorder %s66_s8, %s6149_s24  ;;  %p6154_p3 = scmp.lt.s32.totalorder %s66_s8, %s66_s8 }
  0x45   :  { %p6155_p4 = scmp.lt.s32.totalorder %s6153_s25, %s6149_s24 }
  0x47   :  { %p6156_p5 = por %p6155_p4, %p6154_p3 }
  0x49   :  { %p6157_p6 = pnand %p6156_p5, %p6150_p2 }
  0x4b   :  { %6160 = shalt.err (!%p6157_p6)
}
  0x4c   :  { %68 = dma.hbm_to_vmem [thread:$0]  %s6834_s4, 16, %s66_s8, [#allocation11]  }
  0x4d   :  { %6183 = dma.done.wait [#allocation5], 16  }
  0x4e   :  { %6184 = vsyncadd [#allocation5], 4294967280 }
  0x4f   :  { %6185 = dma.done.wait [#allocation3], 256  }
  0x50   :  { %6186 = vsyncadd [#allocation3], 4294967040 }
  0x51   :  { %6187 = dma.done.wait [#allocation8], 768  }
  0x52   :  { %6188 = vsyncadd [#allocation8], 4294966528 }
  0x53   :  { %6189 = dma.done.wait [#allocation11], 16  }
  0x54   :  { %6190 = vsyncadd [#allocation11], 4294967280 }
  0x55   :  { %84 = sfence }
  0x56   :  { %v6300_v0 = vld [vmem:[#allocation6] sm:$0xff]  ;;  %v6302_v1 = vld [vmem:[#allocation6 + $0x8] sm:$0xff]  ;;  %vm100_vm0 = vcmask 261120   ;;  %v6304_v2 = vld [vmem:[#allocation7] sm:$0xff]  ;;  %vm104_vm1 = vcmask 130048   ;;  %s6332_s4 = sld [smem:[#allocation2]] }
  0x57   :  { %101 = vst.msk [vmem:[#allocation12] sm:$0xff] %vm100_vm0, %v6300_v0  ;;  %102 = vst.msk [vmem:[#allocation12 + $0x8] sm:$0xff] %vm100_vm0, %v6302_v1  ;;  %v5716_v3 = vpack.c.bf16 %v6302_v1, %v6300_v0  ;;  %5216 = vmatprep.mubr.msk.f32.mxu1 %vm104_vm1, %v6304_v2  ;;  %v87_v4 = vld [vmem:[#allocation9] sm:$0xff]  ;;  %v88_v5 = vld [vmem:[#allocation9 + $0x8] sm:$0xff]  ;;  %5234 = vmatprep.mubr.msk.f32.mxu0 %vm104_vm1, %v6304_v2  ;;  %s6405_s28 = sld [smem:[#allocation2 + $0x1]]  ;;  %s6476_s8 = sld [smem:[#allocation2 + $0x2]] }
  0x58   :  { %v6316_v6 = vpack.c.bf16 %v88_v5, %v87_v4  ;;  %v89_v7 = vld [vmem:[#allocation9 + $0x10] sm:$0xff]  ;;  %v90_v8 = vld [vmem:[#allocation9 + $0x18] sm:$0xff]  ;;  %v6334_v13 = vld [vmem:[#allocation10] ss:$0 sm:$0xff]  ;;  %s6547_s11 = sld [smem:[#allocation2 + $0x3]]  ;;  %s6618_s14 = sld [smem:[#allocation2 + $0x4]] }
  0x59   :  { %5717 = vmatprep.subr.bf16.mxu1 %v5716_v3  ;;  %v6318_v9 = vld [vmem:[#allocation7 + $0x8] sm:$0xff]  ;;  %v6321_v10 = vpack.c.bf16 %v90_v8, %v89_v7  ;;  %s6695_s21 = sld [smem:[#allocation2 + $0x5]]  ;;  %s6766_s18 = sld [smem:[#allocation2 + $0x6]] }
  0x5a   :  { %5719 = vmatpush3.bf16.msra.mxu1 %v5716_v3  ;;  %s6200_s20 = smov [#allocation12]  }
  0x5b   :  { %5721 = vmatprep.subr.bf16.mxu1 %v6316_v6  ;;  %s4798_s22 = sshll.u32 %s6200_s20, 4  ;;  %s4799_s22 = int_to_ptr.vmem [resolvable:$true] %s4798_s22 }
  0x5c   :  { %s269_s0 = smul.f32 0.5, %s6332_s4  ;;  %v603_v46 = vstv %s6332_s4  ;;  %s6161_s23 = scalar_lea.vmem %s4799_s22, 2048 }
  0x5d   :  { %5217 = vmatmul.mubr.msk.f32.vlgmr.msra.gmra.mrb[0].mxu1 %vm104_vm1, %v6318_v9  ;;  %s770_s27 = smul.f32 0.16666667, %s6332_s4  ;;  %p6162_p7 = scmp.ne.s32.totalorder %s4799_s22, %s6161_s23 }
  0x5e   :  { %5723 = vmatpush3.bf16.msra.mxu1 %v6316_v6  ;;  %v270_v17 = vstv %s269_s0  ;;  %s938_s29 = smul.f32 0.5, %s6405_s28  ;;  %p6166_p8 = scmp.lt.s32.totalorder %s4799_s22, %s4799_s22 }
  0x5f   :  { %5725 = vmatprep.subr.bf16.mxu1 %v6321_v10  ;;  %v771_v8 = vstv %s770_s27  ;;  %s1439_s7 = smul.f32 0.16666667, %s6405_s28  ;;  %p6167_p9 = scmp.lt.s32.totalorder %s6161_s23, %s6161_s23 }
  0x60   :  { %s1607_s9 = smul.f32 0.5, %s6476_s8 }
  0x61   :  { %s2108_s10 = smul.f32 0.16666667, %s6476_s8  ;;  %p6168_p10 = por %p6167_p9, %p6166_p8 }
  0x62   :  { %5727 = vmatpush3.bf16.msra.mxu1 %v6321_v10  ;;  %s2276_s12 = smul.f32 0.5, %s6547_s11 }
  0x63   :  { %s2777_s13 = smul.f32 0.16666667, %s6547_s11  ;;  %p6169_p11 = pnand %p6168_p10, %p6162_p7 }
  0x64   :  { %s2945_s15 = smul.f32 0.5, %s6618_s14 }
  0x65   :  { %s3446_s1 = smul.f32 0.16666667, %s6618_s14 }
  0x66   :  { %s3614_s16 = smul.f32 0.5, %s6695_s21 }
  0x67   :  { %s4115_s17 = smul.f32 0.16666667, %s6695_s21 }
  0x68   :  { %s4283_s2 = smul.f32 0.5, %s6766_s18 }
  0x69   :  { %s4784_s19 = smul.f32 0.16666667, %s6766_s18 }
 0x130   :  { %v5218_v11 = vpop.f32.mrb[0].mxu1 }
 0x131   :  { %v177_v12 = vpop.f32.mrb[1].mxu1 }
 0x132   :  { %5227 = vmatprep.mubr.msk.f32.mxu1 %vm100_vm0, %v177_v12 }
 0x133   :  { %5228 = vmatmul.mubr.msk.f32.vlgmr.msra.gmra.mrb[2].mxu1 %vm100_vm0, %v5218_v11 }
 0x134   :  { %5252 = vmatprep.mubr.msk.f32.mxu1 %vm104_vm1, %v6304_v2 }
 0x206   :  { %v5229_v14 = vpop.f32.mrb[2].mxu1 }
 0x207   :  { %v264_v15 = vadd.f32 %v5229_v14, %v6334_v13  ;;  %v258_v16 = vpop.f32.mrb[3].mxu1 }
 0x208   :  { %v259_v18 = vadd.f32 %v6334_v13, %v258_v16 }
 0x209   :  { %v268_v19 = vmax.f32 %v264_v15, 0.0 }
 0x20a   :  { %v267_v20 = vmax.f32 %v259_v18, 0.0 }
 0x20b   :  { %v272_v21 = vmul.f32 %v270_v17, %v268_v19 }
 0x20c   :  { %v271_v22 = vmul.f32 %v270_v17, %v267_v20 }
 0x20d   :  { %v274_v23 = vadd.f32 %v272_v21, %v6302_v1 }
 0x20e   :  { %v273_v24 = vadd.f32 %v271_v22, %v6300_v0 }
 0x210   :  { %v5728_v25 = vpack.c.bf16 %v274_v23, %v273_v24  ;;  %v939_v23 = vstv %s938_s29 }
 0x212   :  { %5729 = vmatprep.subr.bf16.mxu0 %v5728_v25 }
 0x213   :  { %5731 = vmatpush3.bf16.msra.mxu0 %v5728_v25 }
 0x214   :  { %5733 = vmatprep.subr.bf16.mxu0 %v6316_v6 }
 0x216   :  { %5235 = vmatmul.mubr.msk.f32.vlgmr.msra.gmra.mrb[0].mxu0 %vm104_vm1, %v6318_v9 }
 0x217   :  { %5735 = vmatpush3.bf16.msra.mxu0 %v6316_v6 }
 0x218   :  { %5737 = vmatprep.subr.bf16.mxu0 %v6321_v10 }
 0x21b   :  { %5739 = vmatpush3.bf16.msra.mxu0 %v6321_v10 }
 0x2e9   :  { %v5236_v26 = vpop.f32.mrb[0].mxu0 }
 0x2ea   :  { %v341_v27 = vpop.f32.mrb[1].mxu0 }
 0x2eb   :  { %5245 = vmatprep.mubr.msk.f32.mxu0 %vm100_vm0, %v341_v27 }
 0x2ec   :  { %5246 = vmatmul.mubr.msk.f32.vlgmr.msra.gmra.mrb[2].mxu0 %vm100_vm0, %v5236_v26 }
 0x2ed   :  { %5270 = vmatprep.mubr.msk.f32.mxu0 %vm104_vm1, %v6304_v2 }
 0x3bf   :  { %v5247_v28 = vpop.f32.mrb[2].mxu0 }
 0x3c0   :  { %v428_v29 = vadd.f32 %v5247_v28, %v6334_v13  ;;  %v422_v30 = vpop.f32.mrb[3].mxu0 }
 0x3c1   :  { %v423_v31 = vadd.f32 %v6334_v13, %v422_v30 }
 0x3c2   :  { %v432_v32 = vmax.f32 %v428_v29, 0.0 }
 0x3c3   :  { %v431_v33 = vmax.f32 %v423_v31, 0.0 }
 0x3c4   :  { %v438_v34 = vmul.f32 %v432_v32, %v270_v17  ;;  %v434_v42 = vmul.f32 2.0, %v432_v32 }
 0x3c5   :  { %v437_v35 = vmul.f32 %v431_v33, %v270_v17  ;;  %v433_v45 = vmul.f32 2.0, %v431_v33 }
 0x3c6   :  { %v440_v36 = vadd.f32 %v438_v34, %v6302_v1  ;;  %v436_v50 = vadd.f32 %v434_v42, %v268_v19 }
 0x3c7   :  { %v439_v37 = vadd.f32 %v437_v35, %v6300_v0  ;;  %v435_v53 = vadd.f32 %v433_v45, %v267_v20 }
 0x3c9   :  { %v5740_v38 = vpack.c.bf16 %v440_v36, %v439_v37 }
 0x3cb   :  { %5741 = vmatprep.subr.bf16.mxu1 %v5740_v38 }
 0x3cc   :  { %5743 = vmatpush3.bf16.msra.mxu1 %v5740_v38 }
 0x3cd   :  { %5745 = vmatprep.subr.bf16.mxu1 %v6316_v6 }
 0x3cf   :  { %5253 = vmatmul.mubr.msk.f32.vlgmr.msra.gmra.mrb[4].mxu1 %vm104_vm1, %v6318_v9 }
 0x3d0   :  { %5747 = vmatpush3.bf16.msra.mxu1 %v6316_v6 }
 0x3d1   :  { %5749 = vmatprep.subr.bf16.mxu1 %v6321_v10 }
 0x3d4   :  { %5751 = vmatpush3.bf16.msra.mxu1 %v6321_v10 }
 0x4a2   :  { %v5254_v39 = vpop.f32.mrb[4].mxu1 }
 0x4a3   :  { %v507_v40 = vpop.f32.mrb[5].mxu1 }
 0x4a4   :  { %5263 = vmatprep.mubr.msk.f32.mxu1 %vm100_vm0, %v507_v40 }
 0x4a5   :  { %5264 = vmatmul.mubr.msk.f32.vlgmr.msra.gmra.mrb[6].mxu1 %vm100_vm0, %v5254_v39 }
 0x4a6   :  { %5288 = vmatprep.mubr.msk.f32.mxu1 %vm104_vm1, %v6304_v2 }
 0x578   :  { %v5265_v41 = vpop.f32.mrb[6].mxu1 }
 0x579   :  { %v594_v43 = vadd.f32 %v5265_v41, %v6334_v13  ;;  %v588_v44 = vpop.f32.mrb[7].mxu1 }
 0x57a   :  { %v589_v47 = vadd.f32 %v6334_v13, %v588_v44 }
 0x57b   :  { %v598_v48 = vmax.f32 %v594_v43, 0.0 }
 0x57c   :  { %v597_v49 = vmax.f32 %v589_v47, 0.0 }
 0x57d   :  { %v600_v51 = vmul.f32 2.0, %v598_v48  ;;  %v605_v52 = vmul.f32 %v603_v46, %v598_v48 }
 0x57e   :  { %v599_v54 = vmul.f32 2.0, %v597_v49  ;;  %v604_v55 = vmul.f32 %v603_v46, %v597_v49 }
 0x57f   :  { %v607_v56 = vadd.f32 %v605_v52, %v6302_v1  ;;  %v602_v57 = vadd.f32 %v600_v51, %v436_v50  ;;  %v1272_v52 = vstv %s6405_s28 }
 0x580   :  { %v606_v58 = vadd.f32 %v604_v55, %v6300_v0  ;;  %v601_v59 = vadd.f32 %v599_v54, %v435_v53 }
 0x582   :  { %v5752_v60 = vpack.c.bf16 %v607_v56, %v606_v58 }
 0x584   :  { %5753 = vmatprep.subr.bf16.mxu0 %v5752_v60 }
 0x585   :  { %5755 = vmatpush3.bf16.msra.mxu0 %v5752_v60 }
 0x586   :  { %5757 = vmatprep.subr.bf16.mxu0 %v6316_v6 }
 0x588   :  { %5271 = vmatmul.mubr.msk.f32.vlgmr.msra.gmra.mrb[4].mxu0 %vm104_vm1, %v6318_v9 }
 0x589   :  { %5759 = vmatpush3.bf16.msra.mxu0 %v6316_v6 }
 0x58a   :  { %5761 = vmatprep.subr.bf16.mxu0 %v6321_v10 }
 0x58d   :  { %5763 = vmatpush3.bf16.msra.mxu0 %v6321_v10 }
 0x65b   :  { %v5272_v61 = vpop.f32.mrb[4].mxu0 }
 0x65c   :  { %v674_v62 = vpop.f32.mrb[5].mxu0 }
 0x65d   :  { %5281 = vmatprep.mubr.msk.f32.mxu0 %vm100_vm0, %v674_v62 }
 0x65e   :  { %5282 = vmatmul.mubr.msk.f32.vlgmr.msra.gmra.mrb[6].mxu0 %vm100_vm0, %v5272_v61 }
 0x65f   :  { %5306 = vmatprep.mubr.msk.f32.mxu0 %vm104_vm1, %v6304_v2 }
 0x731   :  { %v5283_v63 = vpop.f32.mrb[6].mxu0 }
 0x732   :  { %v761_v3 = vadd.f32 %v5283_v63, %v6334_v13  ;;  %v755_v4 = vpop.f32.mrb[7].mxu0 }
 0x733   :  { %v756_v5 = vadd.f32 %v6334_v13, %v755_v4 }
 0x734   :  { %v765_v7 = vmax.f32 %v761_v3, 0.0 }
 0x735   :  { %v764_v11 = vmax.f32 %v756_v5, 0.0 }
 0x736   :  { %v767_v12 = vadd.f32 %v765_v7, %v602_v57 }
 0x737   :  { %v766_v14 = vadd.f32 %v764_v11, %v601_v59 }
 0x738   :  { %v773_v15 = vmul.f32 %v771_v8, %v767_v12 }
 0x739   :  { %v772_v16 = vmul.f32 %v771_v8, %v766_v14 }
 0x73a   :  { %v6384_v17 = vadd.f32 %v773_v15, %v6302_v1 }
 0x73b   :  { %v6387_v18 = vadd.f32 %v772_v16, %v6300_v0 }
 0x73c   :  { %778 = vst.msk [vmem:[#allocation12 + $0x18] sm:$0xff] %vm100_vm0, %v6384_v17 }
 0x73d   :  { %777 = vst.msk [vmem:[#allocation12 + $0x10] sm:$0xff] %vm100_vm0, %v6387_v18  ;;  %v5764_v19 = vpack.c.bf16 %v6384_v17, %v6387_v18 }
 0x73f   :  { %5765 = vmatprep.subr.bf16.mxu1 %v5764_v19 }
 0x740   :  { %5767 = vmatpush3.bf16.msra.mxu1 %v5764_v19  ;;  %v1440_v19 = vstv %s1439_s7 }
 0x741   :  { %5769 = vmatprep.subr.bf16.mxu1 %v6316_v6 }
 0x743   :  { %5289 = vmatmul.mubr.msk.f32.vlgmr.msra.gmra.mrb[8].mxu1 %vm104_vm1, %v6318_v9 }
 0x744   :  { %5771 = vmatpush3.bf16.msra.mxu1 %v6316_v6 }
 0x745   :  { %5773 = vmatprep.subr.bf16.mxu1 %v6321_v10 }
 0x748   :  { %5775 = vmatpush3.bf16.msra.mxu1 %v6321_v10 }
 0x816   :  { %v5290_v0 = vpop.f32.mrb[8].mxu1 }
 0x817   :  { %v846_v1 = vpop.f32.mrb[9].mxu1 }
 0x818   :  { %5299 = vmatprep.mubr.msk.f32.mxu1 %vm100_vm0, %v846_v1 }
 0x819   :  { %5300 = vmatmul.mubr.msk.f32.vlgmr.msra.gmra.mrb[10].mxu1 %vm100_vm0, %v5290_v0 }
 0x81a   :  { %5324 = vmatprep.mubr.msk.f32.mxu1 %vm104_vm1, %v6304_v2 }
 0x8ec   :  { %v5301_v20 = vpop.f32.mrb[10].mxu1 }
 0x8ed   :  { %v933_v21 = vadd.f32 %v5301_v20, %v6334_v13  ;;  %v927_v22 = vpop.f32.mrb[11].mxu1 }
 0x8ee   :  { %v928_v24 = vadd.f32 %v6334_v13, %v927_v22 }
 0x8ef   :  { %v937_v25 = vmax.f32 %v933_v21, 0.0 }
 0x8f0   :  { %v936_v26 = vmax.f32 %v928_v24, 0.0 }
 0x8f1   :  { %v941_v27 = vmul.f32 %v939_v23, %v937_v25 }
 0x8f2   :  { %v940_v28 = vmul.f32 %v939_v23, %v936_v26 }
 0x8f3   :  { %v943_v29 = vadd.f32 %v941_v27, %v6384_v17 }
 0x8f4   :  { %v942_v30 = vadd.f32 %v940_v28, %v6387_v18 }
 0x8f6   :  { %v5776_v31 = vpack.c.bf16 %v943_v29, %v942_v30  ;;  %v1608_v29 = vstv %s1607_s9 }
 0x8f8   :  { %5777 = vmatprep.subr.bf16.mxu0 %v5776_v31 }
 0x8f9   :  { %5779 = vmatpush3.bf16.msra.mxu0 %v5776_v31 }
 0x8fa   :  { %5781 = vmatprep.subr.bf16.mxu0 %v6316_v6 }
 0x8fc   :  { %5307 = vmatmul.mubr.msk.f32.vlgmr.msra.gmra.mrb[8].mxu0 %vm104_vm1, %v6318_v9 }
 0x8fd   :  { %5783 = vmatpush3.bf16.msra.mxu0 %v6316_v6 }
 0x8fe   :  { %5785 = vmatprep.subr.bf16.mxu0 %v6321_v10 }
 0x901   :  { %5787 = vmatpush3.bf16.msra.mxu0 %v6321_v10 }
 0x9cf   :  { %v5308_v32 = vpop.f32.mrb[8].mxu0 }
 0x9d0   :  { %v1010_v33 = vpop.f32.mrb[9].mxu0 }
 0x9d1   :  { %5317 = vmatprep.mubr.msk.f32.mxu0 %vm100_vm0, %v1010_v33 }
 0x9d2   :  { %5318 = vmatmul.mubr.msk.f32.vlgmr.msra.gmra.mrb[10].mxu0 %vm100_vm0, %v5308_v32 }
 0x9d3   :  { %5342 = vmatprep.mubr.msk.f32.mxu0 %vm104_vm1, %v6304_v2 }
 0xaa5   :  { %v5319_v34 = vpop.f32.mrb[10].mxu0 }
 0xaa6   :  { %v1097_v35 = vadd.f32 %v5319_v34, %v6334_v13  ;;  %v1091_v36 = vpop.f32.mrb[11].mxu0 }
 0xaa7   :  { %v1092_v37 = vadd.f32 %v6334_v13, %v1091_v36 }
 0xaa8   :  { %v1101_v38 = vmax.f32 %v1097_v35, 0.0 }
 0xaa9   :  { %v1100_v39 = vmax.f32 %v1092_v37, 0.0 }
 0xaaa   :  { %v1107_v40 = vmul.f32 %v1101_v38, %v939_v23  ;;  %v1103_v48 = vmul.f32 2.0, %v1101_v38 }
 0xaab   :  { %v1106_v41 = vmul.f32 %v1100_v39, %v939_v23  ;;  %v1102_v51 = vmul.f32 2.0, %v1100_v39 }
 0xaac   :  { %v1109_v42 = vadd.f32 %v1107_v40, %v6384_v17  ;;  %v1105_v56 = vadd.f32 %v1103_v48, %v937_v25 }
 0xaad   :  { %v1108_v43 = vadd.f32 %v1106_v41, %v6387_v18  ;;  %v1104_v59 = vadd.f32 %v1102_v51, %v936_v26 }
 0xaaf   :  { %v5788_v44 = vpack.c.bf16 %v1109_v42, %v1108_v43 }
 0xab1   :  { %5789 = vmatprep.subr.bf16.mxu1 %v5788_v44 }
 0xab2   :  { %5791 = vmatpush3.bf16.msra.mxu1 %v5788_v44 }
 0xab3   :  { %5793 = vmatprep.subr.bf16.mxu1 %v6316_v6 }
 0xab5   :  { %5325 = vmatmul.mubr.msk.f32.vlgmr.msra.gmra.mrb[12].mxu1 %vm104_vm1, %v6318_v9 }
 0xab6   :  { %5795 = vmatpush3.bf16.msra.mxu1 %v6316_v6 }
 0xab7   :  { %5797 = vmatprep.subr.bf16.mxu1 %v6321_v10 }
 0xaba   :  { %5799 = vmatpush3.bf16.msra.mxu1 %v6321_v10 }
 0xb88   :  { %v5326_v45 = vpop.f32.mrb[12].mxu1 }
 0xb89   :  { %v1176_v46 = vpop.f32.mrb[13].mxu1 }
 0xb8a   :  { %5335 = vmatprep.mubr.msk.f32.mxu1 %vm100_vm0, %v1176_v46 }
 0xb8b   :  { %5336 = vmatmul.mubr.msk.f32.vlgmr.msra.gmra.mrb[14].mxu1 %vm100_vm0, %v5326_v45 }
 0xb8c   :  { %5360 = vmatprep.mubr.msk.f32.mxu1 %vm104_vm1, %v6304_v2 }
 0xc5e   :  { %v5337_v47 = vpop.f32.mrb[14].mxu1 }
 0xc5f   :  { %v1263_v49 = vadd.f32 %v5337_v47, %v6334_v13  ;;  %v1257_v50 = vpop.f32.mrb[15].mxu1 }
 0xc60   :  { %v1258_v53 = vadd.f32 %v6334_v13, %v1257_v50 }
 0xc61   :  { %v1267_v54 = vmax.f32 %v1263_v49, 0.0 }
 0xc62   :  { %v1266_v55 = vmax.f32 %v1258_v53, 0.0 }
 0xc63   :  { %v1269_v57 = vmul.f32 2.0, %v1267_v54  ;;  %v1274_v58 = vmul.f32 %v1272_v52, %v1267_v54 }
 0xc64   :  { %v1268_v60 = vmul.f32 2.0, %v1266_v55  ;;  %v1273_v61 = vmul.f32 %v1272_v52, %v1266_v55 }
 0xc65   :  { %v1276_v62 = vadd.f32 %v1274_v58, %v6384_v17  ;;  %v1271_v63 = vadd.f32 %v1269_v57, %v1105_v56  ;;  %v1941_v58 = vstv %s6476_s8 }
 0xc66   :  { %v1275_v3 = vadd.f32 %v1273_v61, %v6387_v18  ;;  %v1270_v4 = vadd.f32 %v1268_v60, %v1104_v59 }
 0xc68   :  { %v5800_v5 = vpack.c.bf16 %v1276_v62, %v1275_v3 }
 0xc6a   :  { %5801 = vmatprep.subr.bf16.mxu0 %v5800_v5 }
 0xc6b   :  { %5803 = vmatpush3.bf16.msra.mxu0 %v5800_v5 }
 0xc6c   :  { %5805 = vmatprep.subr.bf16.mxu0 %v6316_v6 }
 0xc6e   :  { %5343 = vmatmul.mubr.msk.f32.vlgmr.msra.gmra.mrb[12].mxu0 %vm104_vm1, %v6318_v9 }
 0xc6f   :  { %5807 = vmatpush3.bf16.msra.mxu0 %v6316_v6 }
 0xc70   :  { %5809 = vmatprep.subr.bf16.mxu0 %v6321_v10 }
 0xc73   :  { %5811 = vmatpush3.bf16.msra.mxu0 %v6321_v10 }
 0xd41   :  { %v5344_v7 = vpop.f32.mrb[12].mxu0 }
 0xd42   :  { %v1343_v8 = vpop.f32.mrb[13].mxu0 }
 0xd43   :  { %5353 = vmatprep.mubr.msk.f32.mxu0 %vm100_vm0, %v1343_v8 }
 0xd44   :  { %5354 = vmatmul.mubr.msk.f32.vlgmr.msra.gmra.mrb[14].mxu0 %vm100_vm0, %v5344_v7 }
 0xd45   :  { %5378 = vmatprep.mubr.msk.f32.mxu0 %vm104_vm1, %v6304_v2 }
 0xe17   :  { %v5355_v11 = vpop.f32.mrb[14].mxu0 }
 0xe18   :  { %v1430_v12 = vadd.f32 %v5355_v11, %v6334_v13  ;;  %v1424_v14 = vpop.f32.mrb[15].mxu0 }
 0xe19   :  { %v1425_v15 = vadd.f32 %v6334_v13, %v1424_v14 }
 0xe1a   :  { %v1434_v16 = vmax.f32 %v1430_v12, 0.0 }
 0xe1b   :  { %v1433_v0 = vmax.f32 %v1425_v15, 0.0 }
 0xe1c   :  { %v1436_v1 = vadd.f32 %v1434_v16, %v1271_v63 }
 0xe1d   :  { %v1435_v20 = vadd.f32 %v1433_v0, %v1270_v4 }
 0xe1e   :  { %v1442_v21 = vmul.f32 %v1440_v19, %v1436_v1 }
 0xe1f   :  { %v1441_v22 = vmul.f32 %v1440_v19, %v1435_v20 }
 0xe20   :  { %v6455_v23 = vadd.f32 %v1442_v21, %v6384_v17 }
 0xe21   :  { %v6458_v24 = vadd.f32 %v1441_v22, %v6387_v18 }
 0xe22   :  { %1447 = vst.msk [vmem:[#allocation12 + $0x28] sm:$0xff] %vm100_vm0, %v6455_v23 }
 0xe23   :  { %1446 = vst.msk [vmem:[#allocation12 + $0x20] sm:$0xff] %vm100_vm0, %v6458_v24  ;;  %v5812_v25 = vpack.c.bf16 %v6455_v23, %v6458_v24 }
 0xe25   :  { %5813 = vmatprep.subr.bf16.mxu1 %v5812_v25 }
 0xe26   :  { %5815 = vmatpush3.bf16.msra.mxu1 %v5812_v25  ;;  %v2109_v25 = vstv %s2108_s10 }
 0xe27   :  { %5817 = vmatprep.subr.bf16.mxu1 %v6316_v6 }
 0xe29   :  { %5361 = vmatmul.mubr.msk.f32.vlgmr.msra.gmra.mrb[16].mxu1 %vm104_vm1, %v6318_v9 }
 0xe2a   :  { %5819 = vmatpush3.bf16.msra.mxu1 %v6316_v6 }
 0xe2b   :  { %5821 = vmatprep.subr.bf16.mxu1 %v6321_v10 }
 0xe2e   :  { %5823 = vmatpush3.bf16.msra.mxu1 %v6321_v10 }
 0xefc   :  { %v5362_v17 = vpop.f32.mrb[16].mxu1 }
 0xefd   :  { %v1515_v18 = vpop.f32.mrb[17].mxu1 }
 0xefe   :  { %5371 = vmatprep.mubr.msk.f32.mxu1 %vm100_vm0, %v1515_v18 }
 0xeff   :  { %5372 = vmatmul.mubr.msk.f32.vlgmr.msra.gmra.mrb[18].mxu1 %vm100_vm0, %v5362_v17 }
 0xf00   :  { %5396 = vmatprep.mubr.msk.f32.mxu1 %vm104_vm1, %v6304_v2 }
 0xfd2   :  { %v5373_v26 = vpop.f32.mrb[18].mxu1 }
 0xfd3   :  { %v1602_v27 = vadd.f32 %v5373_v26, %v6334_v13  ;;  %v1596_v28 = vpop.f32.mrb[19].mxu1 }
 0xfd4   :  { %v1597_v30 = vadd.f32 %v6334_v13, %v1596_v28 }
 0xfd5   :  { %v1606_v31 = vmax.f32 %v1602_v27, 0.0 }
 0xfd6   :  { %v1605_v32 = vmax.f32 %v1597_v30, 0.0 }
 0xfd7   :  { %v1610_v33 = vmul.f32 %v1608_v29, %v1606_v31 }
 0xfd8   :  { %v1609_v34 = vmul.f32 %v1608_v29, %v1605_v32 }
 0xfd9   :  { %v1612_v35 = vadd.f32 %v1610_v33, %v6455_v23 }
 0xfda   :  { %v1611_v36 = vadd.f32 %v1609_v34, %v6458_v24 }
 0xfdc   :  { %v5824_v37 = vpack.c.bf16 %v1612_v35, %v1611_v36  ;;  %v2277_v35 = vstv %s2276_s12 }
 0xfde   :  { %5825 = vmatprep.subr.bf16.mxu0 %v5824_v37 }
 0xfdf   :  { %5827 = vmatpush3.bf16.msra.mxu0 %v5824_v37 }
 0xfe0   :  { %5829 = vmatprep.subr.bf16.mxu0 %v6316_v6 }
 0xfe2   :  { %5379 = vmatmul.mubr.msk.f32.vlgmr.msra.gmra.mrb[16].mxu0 %vm104_vm1, %v6318_v9 }
 0xfe3   :  { %5831 = vmatpush3.bf16.msra.mxu0 %v6316_v6 }
 0xfe4   :  { %5833 = vmatprep.subr.bf16.mxu0 %v6321_v10 }
 0xfe7   :  { %5835 = vmatpush3.bf16.msra.mxu0 %v6321_v10 }
0x10b5   :  { %v5380_v38 = vpop.f32.mrb[16].mxu0 }
0x10b6   :  { %v1679_v39 = vpop.f32.mrb[17].mxu0 }
0x10b7   :  { %5389 = vmatprep.mubr.msk.f32.mxu0 %vm100_vm0, %v1679_v39 }
0x10b8   :  { %5390 = vmatmul.mubr.msk.f32.vlgmr.msra.gmra.mrb[18].mxu0 %vm100_vm0, %v5380_v38 }
0x10b9   :  { %5414 = vmatprep.mubr.msk.f32.mxu0 %vm104_vm1, %v6304_v2 }
0x118b   :  { %v5391_v40 = vpop.f32.mrb[18].mxu0 }
0x118c   :  { %v1766_v41 = vadd.f32 %v5391_v40, %v6334_v13  ;;  %v1760_v42 = vpop.f32.mrb[19].mxu0 }
0x118d   :  { %v1761_v43 = vadd.f32 %v6334_v13, %v1760_v42 }
0x118e   :  { %v1770_v44 = vmax.f32 %v1766_v41, 0.0 }
0x118f   :  { %v1769_v45 = vmax.f32 %v1761_v43, 0.0 }
0x1190   :  { %v1776_v46 = vmul.f32 %v1770_v44, %v1608_v29  ;;  %v1772_v54 = vmul.f32 2.0, %v1770_v44 }
0x1191   :  { %v1775_v47 = vmul.f32 %v1769_v45, %v1608_v29  ;;  %v1771_v57 = vmul.f32 2.0, %v1769_v45 }
0x1192   :  { %v1778_v48 = vadd.f32 %v1776_v46, %v6455_v23  ;;  %v1774_v62 = vadd.f32 %v1772_v54, %v1606_v31 }
0x1193   :  { %v1777_v49 = vadd.f32 %v1775_v47, %v6458_v24  ;;  %v1773_v4 = vadd.f32 %v1771_v57, %v1605_v32 }
0x1195   :  { %v5836_v50 = vpack.c.bf16 %v1778_v48, %v1777_v49 }
0x1197   :  { %5837 = vmatprep.subr.bf16.mxu1 %v5836_v50 }
0x1198   :  { %5839 = vmatpush3.bf16.msra.mxu1 %v5836_v50 }
0x1199   :  { %5841 = vmatprep.subr.bf16.mxu1 %v6316_v6 }
0x119b   :  { %5397 = vmatmul.mubr.msk.f32.vlgmr.msra.gmra.mrb[20].mxu1 %vm104_vm1, %v6318_v9 }
0x119c   :  { %5843 = vmatpush3.bf16.msra.mxu1 %v6316_v6 }
0x119d   :  { %5845 = vmatprep.subr.bf16.mxu1 %v6321_v10 }
0x11a0   :  { %5847 = vmatpush3.bf16.msra.mxu1 %v6321_v10 }
0x126e   :  { %v5398_v51 = vpop.f32.mrb[20].mxu1 }
0x126f   :  { %v1845_v52 = vpop.f32.mrb[21].mxu1 }
0x1270   :  { %5407 = vmatprep.mubr.msk.f32.mxu1 %vm100_vm0, %v1845_v52 }
0x1271   :  { %5408 = vmatmul.mubr.msk.f32.vlgmr.msra.gmra.mrb[22].mxu1 %vm100_vm0, %v5398_v51 }
0x1272   :  { %5432 = vmatprep.mubr.msk.f32.mxu1 %vm104_vm1, %v6304_v2 }
0x1344   :  { %v5409_v53 = vpop.f32.mrb[22].mxu1 }
0x1345   :  { %v1932_v55 = vadd.f32 %v5409_v53, %v6334_v13  ;;  %v1926_v56 = vpop.f32.mrb[23].mxu1 }
0x1346   :  { %v1927_v59 = vadd.f32 %v6334_v13, %v1926_v56 }
0x1347   :  { %v1936_v60 = vmax.f32 %v1932_v55, 0.0 }
0x1348   :  { %v1935_v61 = vmax.f32 %v1927_v59, 0.0 }
0x1349   :  { %v1938_v63 = vmul.f32 2.0, %v1936_v60  ;;  %v1943_v3 = vmul.f32 %v1941_v58, %v1936_v60 }
0x134a   :  { %v1937_v5 = vmul.f32 2.0, %v1935_v61  ;;  %v1942_v7 = vmul.f32 %v1941_v58, %v1935_v61 }
0x134b   :  { %v1945_v8 = vadd.f32 %v1943_v3, %v6455_v23  ;;  %v1940_v11 = vadd.f32 %v1938_v63, %v1774_v62  ;;  %v2610_v3 = vstv %s6547_s11 }
0x134c   :  { %v1944_v12 = vadd.f32 %v1942_v7, %v6458_v24  ;;  %v1939_v14 = vadd.f32 %v1937_v5, %v1773_v4 }
0x134e   :  { %v5848_v15 = vpack.c.bf16 %v1945_v8, %v1944_v12 }
0x1350   :  { %5849 = vmatprep.subr.bf16.mxu0 %v5848_v15 }
0x1351   :  { %5851 = vmatpush3.bf16.msra.mxu0 %v5848_v15 }
0x1352   :  { %5853 = vmatprep.subr.bf16.mxu0 %v6316_v6 }
0x1354   :  { %5415 = vmatmul.mubr.msk.f32.vlgmr.msra.gmra.mrb[20].mxu0 %vm104_vm1, %v6318_v9 }
0x1355   :  { %5855 = vmatpush3.bf16.msra.mxu0 %v6316_v6 }
0x1356   :  { %5857 = vmatprep.subr.bf16.mxu0 %v6321_v10 }
0x1359   :  { %5859 = vmatpush3.bf16.msra.mxu0 %v6321_v10 }
0x1427   :  { %v5416_v16 = vpop.f32.mrb[20].mxu0 }
0x1428   :  { %v2012_v19 = vpop.f32.mrb[21].mxu0 }
0x1429   :  { %5425 = vmatprep.mubr.msk.f32.mxu0 %vm100_vm0, %v2012_v19 }
0x142a   :  { %5426 = vmatmul.mubr.msk.f32.vlgmr.msra.gmra.mrb[22].mxu0 %vm100_vm0, %v5416_v16 }
0x142b   :  { %5450 = vmatprep.mubr.msk.f32.mxu0 %vm104_vm1, %v6304_v2 }
0x14fd   :  { %v5427_v0 = vpop.f32.mrb[22].mxu0 }
0x14fe   :  { %v2099_v1 = vadd.f32 %v5427_v0, %v6334_v13  ;;  %v2093_v20 = vpop.f32.mrb[23].mxu0 }
0x14ff   :  { %v2094_v21 = vadd.f32 %v6334_v13, %v2093_v20 }
0x1500   :  { %v2103_v22 = vmax.f32 %v2099_v1, 0.0 }
0x1501   :  { %v2102_v17 = vmax.f32 %v2094_v21, 0.0 }
0x1502   :  { %v2105_v18 = vadd.f32 %v2103_v22, %v1940_v11 }
0x1503   :  { %v2104_v26 = vadd.f32 %v2102_v17, %v1939_v14 }
0x1504   :  { %v2111_v27 = vmul.f32 %v2109_v25, %v2105_v18 }
0x1505   :  { %v2110_v28 = vmul.f32 %v2109_v25, %v2104_v26 }
0x1506   :  { %v6526_v29 = vadd.f32 %v2111_v27, %v6455_v23 }
0x1507   :  { %v6529_v30 = vadd.f32 %v2110_v28, %v6458_v24 }
0x1508   :  { %2116 = vst.msk [vmem:[#allocation12 + $0x38] sm:$0xff] %vm100_vm0, %v6526_v29 }
0x1509   :  { %2115 = vst.msk [vmem:[#allocation12 + $0x30] sm:$0xff] %vm100_vm0, %v6529_v30  ;;  %v5860_v31 = vpack.c.bf16 %v6526_v29, %v6529_v30 }
0x150b   :  { %5861 = vmatprep.subr.bf16.mxu1 %v5860_v31 }
0x150c   :  { %5863 = vmatpush3.bf16.msra.mxu1 %v5860_v31  ;;  %v2778_v31 = vstv %s2777_s13 }
0x150d   :  { %5865 = vmatprep.subr.bf16.mxu1 %v6316_v6 }
0x150f   :  { %5433 = vmatmul.mubr.msk.f32.vlgmr.msra.gmra.mrb[24].mxu1 %vm104_vm1, %v6318_v9 }
0x1510   :  { %5867 = vmatpush3.bf16.msra.mxu1 %v6316_v6 }
0x1511   :  { %5869 = vmatprep.subr.bf16.mxu1 %v6321_v10 }
0x1514   :  { %5871 = vmatpush3.bf16.msra.mxu1 %v6321_v10 }
0x15e2   :  { %v5434_v23 = vpop.f32.mrb[24].mxu1 }
0x15e3   :  { %v2184_v24 = vpop.f32.mrb[25].mxu1 }
0x15e4   :  { %5443 = vmatprep.mubr.msk.f32.mxu1 %vm100_vm0, %v2184_v24 }
0x15e5   :  { %5444 = vmatmul.mubr.msk.f32.vlgmr.msra.gmra.mrb[26].mxu1 %vm100_vm0, %v5434_v23 }
0x15e6   :  { %5468 = vmatprep.mubr.msk.f32.mxu1 %vm104_vm1, %v6304_v2 }
0x16b8   :  { %v5445_v32 = vpop.f32.mrb[26].mxu1 }
0x16b9   :  { %v2271_v33 = vadd.f32 %v5445_v32, %v6334_v13  ;;  %v2265_v34 = vpop.f32.mrb[27].mxu1 }
0x16ba   :  { %v2266_v36 = vadd.f32 %v6334_v13, %v2265_v34 }
0x16bb   :  { %v2275_v37 = vmax.f32 %v2271_v33, 0.0 }
0x16bc   :  { %v2274_v38 = vmax.f32 %v2266_v36, 0.0 }
0x16bd   :  { %v2279_v39 = vmul.f32 %v2277_v35, %v2275_v37 }
0x16be   :  { %v2278_v40 = vmul.f32 %v2277_v35, %v2274_v38 }
0x16bf   :  { %v2281_v41 = vadd.f32 %v2279_v39, %v6526_v29 }
0x16c0   :  { %v2280_v42 = vadd.f32 %v2278_v40, %v6529_v30 }
0x16c2   :  { %v5872_v43 = vpack.c.bf16 %v2281_v41, %v2280_v42  ;;  %v2946_v41 = vstv %s2945_s15 }
0x16c4   :  { %5873 = vmatprep.subr.bf16.mxu0 %v5872_v43 }
0x16c5   :  { %5875 = vmatpush3.bf16.msra.mxu0 %v5872_v43 }
0x16c6   :  { %5877 = vmatprep.subr.bf16.mxu0 %v6316_v6 }
0x16c8   :  { %5451 = vmatmul.mubr.msk.f32.vlgmr.msra.gmra.mrb[24].mxu0 %vm104_vm1, %v6318_v9 }
0x16c9   :  { %5879 = vmatpush3.bf16.msra.mxu0 %v6316_v6 }
0x16ca   :  { %5881 = vmatprep.subr.bf16.mxu0 %v6321_v10 }
0x16cd   :  { %5883 = vmatpush3.bf16.msra.mxu0 %v6321_v10 }
0x179b   :  { %v5452_v44 = vpop.f32.mrb[24].mxu0 }
0x179c   :  { %v2348_v45 = vpop.f32.mrb[25].mxu0 }
0x179d   :  { %5461 = vmatprep.mubr.msk.f32.mxu0 %vm100_vm0, %v2348_v45 }
0x179e   :  { %5462 = vmatmul.mubr.msk.f32.vlgmr.msra.gmra.mrb[26].mxu0 %vm100_vm0, %v5452_v44 }
0x179f   :  { %5486 = vmatprep.mubr.msk.f32.mxu0 %vm104_vm1, %v6304_v2 }
0x1871   :  { %v5463_v46 = vpop.f32.mrb[26].mxu0 }
0x1872   :  { %v2435_v47 = vadd.f32 %v5463_v46, %v6334_v13  ;;  %v2429_v48 = vpop.f32.mrb[27].mxu0 }
0x1873   :  { %v2430_v49 = vadd.f32 %v6334_v13, %v2429_v48 }
0x1874   :  { %v2439_v50 = vmax.f32 %v2435_v47, 0.0 }
0x1875   :  { %v2438_v51 = vmax.f32 %v2430_v49, 0.0 }
0x1876   :  { %v2445_v52 = vmul.f32 %v2439_v50, %v2277_v35  ;;  %v2441_v60 = vmul.f32 2.0, %v2439_v50 }
0x1877   :  { %v2444_v53 = vmul.f32 %v2438_v51, %v2277_v35  ;;  %v2440_v63 = vmul.f32 2.0, %v2438_v51 }
0x1878   :  { %v2447_v54 = vadd.f32 %v2445_v52, %v6526_v29  ;;  %v2443_v8 = vadd.f32 %v2441_v60, %v2275_v37 }
0x1879   :  { %v2446_v55 = vadd.f32 %v2444_v53, %v6529_v30  ;;  %v2442_v14 = vadd.f32 %v2440_v63, %v2274_v38 }
0x187b   :  { %v5884_v56 = vpack.c.bf16 %v2447_v54, %v2446_v55 }
0x187d   :  { %5885 = vmatprep.subr.bf16.mxu1 %v5884_v56 }
0x187e   :  { %5887 = vmatpush3.bf16.msra.mxu1 %v5884_v56 }
0x187f   :  { %5889 = vmatprep.subr.bf16.mxu1 %v6316_v6 }
0x1881   :  { %5469 = vmatmul.mubr.msk.f32.vlgmr.msra.gmra.mrb[28].mxu1 %vm104_vm1, %v6318_v9 }
0x1882   :  { %5891 = vmatpush3.bf16.msra.mxu1 %v6316_v6 }
0x1883   :  { %5893 = vmatprep.subr.bf16.mxu1 %v6321_v10 }
0x1886   :  { %5895 = vmatpush3.bf16.msra.mxu1 %v6321_v10 }
0x1954   :  { %v5470_v57 = vpop.f32.mrb[28].mxu1 }
0x1955   :  { %v2514_v58 = vpop.f32.mrb[29].mxu1 }
0x1956   :  { %5479 = vmatprep.mubr.msk.f32.mxu1 %vm100_vm0, %v2514_v58 }
0x1957   :  { %5480 = vmatmul.mubr.msk.f32.vlgmr.msra.gmra.mrb[30].mxu1 %vm100_vm0, %v5470_v57 }
0x1958   :  { %5504 = vmatprep.mubr.msk.f32.mxu1 %vm104_vm1, %v6304_v2 }
0x1a2a   :  { %v5481_v59 = vpop.f32.mrb[30].mxu1 }
0x1a2b   :  { %v2601_v61 = vadd.f32 %v5481_v59, %v6334_v13  ;;  %v2595_v62 = vpop.f32.mrb[31].mxu1 }
0x1a2c   :  { %v2596_v4 = vadd.f32 %v6334_v13, %v2595_v62 }
0x1a2d   :  { %v2605_v5 = vmax.f32 %v2601_v61, 0.0 }
0x1a2e   :  { %v2604_v7 = vmax.f32 %v2596_v4, 0.0 }
0x1a2f   :  { %v2607_v11 = vmul.f32 2.0, %v2605_v5  ;;  %v2612_v12 = vmul.f32 %v2610_v3, %v2605_v5 }
0x1a30   :  { %v2606_v15 = vmul.f32 2.0, %v2604_v7  ;;  %v2611_v16 = vmul.f32 %v2610_v3, %v2604_v7  ;;  %v6647_v3 = vld [vmem:[#allocation7] sm:$0xff] }
0x1a31   :  { %v2614_v19 = vadd.f32 %v2612_v12, %v6526_v29  ;;  %v2609_v0 = vadd.f32 %v2607_v11, %v2443_v8  ;;  %v3279_v11 = vstv %s6618_s14 }
0x1a32   :  { %v2613_v1 = vadd.f32 %v2611_v16, %v6529_v30  ;;  %v2608_v20 = vadd.f32 %v2606_v15, %v2442_v14 }
0x1a34   :  { %v5896_v21 = vpack.c.bf16 %v2614_v19, %v2613_v1 }
0x1a36   :  { %5897 = vmatprep.subr.bf16.mxu0 %v5896_v21 }
0x1a37   :  { %5899 = vmatpush3.bf16.msra.mxu0 %v5896_v21 }
0x1a38   :  { %5901 = vmatprep.subr.bf16.mxu0 %v6316_v6 }
0x1a3a   :  { %5487 = vmatmul.mubr.msk.f32.vlgmr.msra.gmra.mrb[28].mxu0 %vm104_vm1, %v6318_v9 }
0x1a3b   :  { %5903 = vmatpush3.bf16.msra.mxu0 %v6316_v6 }
0x1a3c   :  { %5905 = vmatprep.subr.bf16.mxu0 %v6321_v10 }
0x1a3f   :  { %5907 = vmatpush3.bf16.msra.mxu0 %v6321_v10 }
0x1b0d   :  { %v5488_v22 = vpop.f32.mrb[28].mxu0 }
0x1b0e   :  { %v2681_v25 = vpop.f32.mrb[29].mxu0 }
0x1b0f   :  { %5497 = vmatprep.mubr.msk.f32.mxu0 %vm100_vm0, %v2681_v25 }
0x1b10   :  { %5498 = vmatmul.mubr.msk.f32.vlgmr.msra.gmra.mrb[30].mxu0 %vm100_vm0, %v5488_v22 }
0x1b11   :  { %5522 = vmatprep.mubr.msk.f32.mxu0 %vm104_vm1, %v6304_v2 }
0x1be3   :  { %v5499_v17 = vpop.f32.mrb[30].mxu0 }
0x1be4   :  { %v2768_v18 = vadd.f32 %v5499_v17, %v6334_v13  ;;  %v2762_v26 = vpop.f32.mrb[31].mxu0 }
0x1be5   :  { %v2763_v27 = vadd.f32 %v6334_v13, %v2762_v26 }
0x1be6   :  { %v2772_v28 = vmax.f32 %v2768_v18, 0.0 }
0x1be7   :  { %v2771_v23 = vmax.f32 %v2763_v27, 0.0 }
0x1be8   :  { %v2774_v24 = vadd.f32 %v2772_v28, %v2609_v0 }
0x1be9   :  { %v2773_v32 = vadd.f32 %v2771_v23, %v2608_v20  ;;  %v6669_v23 = vld [vmem:[#allocation10] ss:$0 sm:$0xff] }
0x1bea   :  { %v2780_v33 = vmul.f32 %v2778_v31, %v2774_v24 }
0x1beb   :  { %v2779_v34 = vmul.f32 %v2778_v31, %v2773_v32 }
0x1bec   :  { %v6597_v35 = vadd.f32 %v2780_v33, %v6526_v29 }
0x1bed   :  { %v6600_v36 = vadd.f32 %v2779_v34, %v6529_v30 }
0x1bee   :  { %2785 = vst.msk [vmem:[#allocation12 + $0x48] sm:$0xff] %vm100_vm0, %v6597_v35 }
0x1bef   :  { %2784 = vst.msk [vmem:[#allocation12 + $0x40] sm:$0xff] %vm100_vm0, %v6600_v36  ;;  %v5908_v37 = vpack.c.bf16 %v6597_v35, %v6600_v36 }
0x1bf1   :  { %5909 = vmatprep.subr.bf16.mxu1 %v5908_v37 }
0x1bf2   :  { %5911 = vmatpush3.bf16.msra.mxu1 %v5908_v37  ;;  %v3447_v37 = vstv %s3446_s1 }
0x1bf3   :  { %5913 = vmatprep.subr.bf16.mxu1 %v6316_v6 }
0x1bf5   :  { %5505 = vmatmul.mubr.msk.f32.vlgmr.msra.gmra.mrb[32].mxu1 %vm104_vm1, %v6318_v9 }
0x1bf6   :  { %5915 = vmatpush3.bf16.msra.mxu1 %v6316_v6 }
0x1bf7   :  { %5917 = vmatprep.subr.bf16.mxu1 %v6321_v10 }
0x1bfa   :  { %5919 = vmatpush3.bf16.msra.mxu1 %v6321_v10 }
0x1cc8   :  { %v5506_v29 = vpop.f32.mrb[32].mxu1 }
0x1cc9   :  { %v2853_v30 = vpop.f32.mrb[33].mxu1 }
0x1cca   :  { %5515 = vmatprep.mubr.msk.f32.mxu1 %vm100_vm0, %v2853_v30 }
0x1ccb   :  { %5516 = vmatmul.mubr.msk.f32.vlgmr.msra.gmra.mrb[34].mxu1 %vm100_vm0, %v5506_v29 }
0x1ccc   :  { %5540 = vmatprep.mubr.msk.f32.mxu1 %vm104_vm1, %v6304_v2 }
0x1d9e   :  { %v5517_v38 = vpop.f32.mrb[34].mxu1 }
0x1d9f   :  { %v2940_v39 = vadd.f32 %v5517_v38, %v6334_v13  ;;  %v2934_v40 = vpop.f32.mrb[35].mxu1 }
0x1da0   :  { %v2935_v42 = vadd.f32 %v6334_v13, %v2934_v40 }
0x1da1   :  { %v2944_v43 = vmax.f32 %v2940_v39, 0.0 }
0x1da2   :  { %v2943_v44 = vmax.f32 %v2935_v42, 0.0 }
0x1da3   :  { %v2948_v45 = vmul.f32 %v2946_v41, %v2944_v43 }
0x1da4   :  { %v2947_v46 = vmul.f32 %v2946_v41, %v2943_v44 }
0x1da5   :  { %v2950_v47 = vadd.f32 %v2948_v45, %v6597_v35 }
0x1da6   :  { %v2949_v48 = vadd.f32 %v2947_v46, %v6600_v36 }
0x1da8   :  { %v5920_v49 = vpack.c.bf16 %v2950_v47, %v2949_v48  ;;  %v3615_v47 = vstv %s3614_s16 }
0x1daa   :  { %5921 = vmatprep.subr.bf16.mxu0 %v5920_v49 }
0x1dab   :  { %5923 = vmatpush3.bf16.msra.mxu0 %v5920_v49 }
0x1dac   :  { %5925 = vmatprep.subr.bf16.mxu0 %v6316_v6 }
0x1dae   :  { %5523 = vmatmul.mubr.msk.f32.vlgmr.msra.gmra.mrb[32].mxu0 %vm104_vm1, %v6318_v9 }
0x1daf   :  { %5927 = vmatpush3.bf16.msra.mxu0 %v6316_v6 }
0x1db0   :  { %5929 = vmatprep.subr.bf16.mxu0 %v6321_v10 }
0x1db3   :  { %5931 = vmatpush3.bf16.msra.mxu0 %v6321_v10 }
0x1e81   :  { %v5524_v50 = vpop.f32.mrb[32].mxu0 }
0x1e82   :  { %v3017_v51 = vpop.f32.mrb[33].mxu0 }
0x1e83   :  { %5533 = vmatprep.mubr.msk.f32.mxu0 %vm100_vm0, %v3017_v51 }
0x1e84   :  { %5534 = vmatmul.mubr.msk.f32.vlgmr.msra.gmra.mrb[34].mxu0 %vm100_vm0, %v5524_v50 }
0x1e85   :  { %5558 = vmatprep.mubr.msk.f32.mxu0 %vm104_vm1, %v6304_v2 }
0x1f57   :  { %v5535_v52 = vpop.f32.mrb[34].mxu0 }
0x1f58   :  { %v3104_v53 = vadd.f32 %v5535_v52, %v6334_v13  ;;  %v3098_v54 = vpop.f32.mrb[35].mxu0 }
0x1f59   :  { %v3099_v55 = vadd.f32 %v6334_v13, %v3098_v54 }
0x1f5a   :  { %v3108_v56 = vmax.f32 %v3104_v53, 0.0 }
0x1f5b   :  { %v3107_v57 = vmax.f32 %v3099_v55, 0.0 }
0x1f5c   :  { %v3114_v58 = vmul.f32 %v3108_v56, %v2946_v41  ;;  %v3110_v5 = vmul.f32 2.0, %v3108_v56 }
0x1f5d   :  { %v3113_v59 = vmul.f32 %v3107_v57, %v2946_v41  ;;  %v3109_v8 = vmul.f32 2.0, %v3107_v57 }
0x1f5e   :  { %v3116_v60 = vadd.f32 %v3114_v58, %v6597_v35  ;;  %v3112_v16 = vadd.f32 %v3110_v5, %v2944_v43 }
0x1f5f   :  { %v3115_v61 = vadd.f32 %v3113_v59, %v6600_v36  ;;  %v3111_v1 = vadd.f32 %v3109_v8, %v2943_v44 }
0x1f61   :  { %v5932_v62 = vpack.c.bf16 %v3116_v60, %v3115_v61 }
0x1f63   :  { %5933 = vmatprep.subr.bf16.mxu1 %v5932_v62 }
0x1f64   :  { %5935 = vmatpush3.bf16.msra.mxu1 %v5932_v62 }
0x1f65   :  { %5937 = vmatprep.subr.bf16.mxu1 %v6316_v6 }
0x1f67   :  { %5541 = vmatmul.mubr.msk.f32.vlgmr.msra.gmra.mrb[36].mxu1 %vm104_vm1, %v6318_v9 }
0x1f68   :  { %5939 = vmatpush3.bf16.msra.mxu1 %v6316_v6 }
0x1f69   :  { %5941 = vmatprep.subr.bf16.mxu1 %v6321_v10 }
0x1f6c   :  { %5943 = vmatpush3.bf16.msra.mxu1 %v6321_v10 }
0x203a   :  { %v5542_v2 = vpop.f32.mrb[36].mxu1 }
0x203b   :  { %v3183_v63 = vpop.f32.mrb[37].mxu1 }
0x203c   :  { %5551 = vmatprep.mubr.msk.f32.mxu1 %vm100_vm0, %v3183_v63 }
0x203d   :  { %5552 = vmatmul.mubr.msk.f32.vlgmr.msra.gmra.mrb[38].mxu1 %vm100_vm0, %v5542_v2 }
0x203e   :  { %5576 = vmatprep.mubr.msk.f32.mxu1 %vm104_vm1, %v6647_v3 }
0x2110   :  { %v5553_v4 = vpop.f32.mrb[38].mxu1 }
0x2111   :  { %v3270_v9 = vadd.f32 %v5553_v4, %v6334_v13  ;;  %v3264_v7 = vpop.f32.mrb[39].mxu1 }
0x2112   :  { %v3265_v12 = vadd.f32 %v6334_v13, %v3264_v7  ;;  %v6657_v13 = vld [vmem:[#allocation7 + $0x8] sm:$0xff] }
0x2113   :  { %v3274_v14 = vmax.f32 %v3270_v9, 0.0 }
0x2114   :  { %v3273_v15 = vmax.f32 %v3265_v12, 0.0 }
0x2115   :  { %v3276_v19 = vmul.f32 2.0, %v3274_v14  ;;  %v3281_v0 = vmul.f32 %v3279_v11, %v3274_v14 }
0x2116   :  { %v3275_v20 = vmul.f32 2.0, %v3273_v15  ;;  %v3280_v21 = vmul.f32 %v3279_v11, %v3273_v15 }
0x2117   :  { %v3283_v22 = vadd.f32 %v3281_v0, %v6597_v35  ;;  %v3278_v25 = vadd.f32 %v3276_v19, %v3112_v16  ;;  %v3948_v0 = vstv %s6695_s21 }
0x2118   :  { %v3282_v17 = vadd.f32 %v3280_v21, %v6600_v36  ;;  %v3277_v18 = vadd.f32 %v3275_v20, %v3111_v1 }
0x211a   :  { %v5944_v26 = vpack.c.bf16 %v3283_v22, %v3282_v17 }
0x211c   :  { %5945 = vmatprep.subr.bf16.mxu0 %v5944_v26 }
0x211d   :  { %5947 = vmatpush3.bf16.msra.mxu0 %v5944_v26 }
0x211e   :  { %5949 = vmatprep.subr.bf16.mxu0 %v6316_v6 }
0x2120   :  { %5559 = vmatmul.mubr.msk.f32.vlgmr.msra.gmra.mrb[36].mxu0 %vm104_vm1, %v6657_v13 }
0x2121   :  { %5951 = vmatpush3.bf16.msra.mxu0 %v6316_v6 }
0x2122   :  { %5953 = vmatprep.subr.bf16.mxu0 %v6321_v10 }
0x2125   :  { %5955 = vmatpush3.bf16.msra.mxu0 %v6321_v10 }
0x21f3   :  { %v5560_v27 = vpop.f32.mrb[36].mxu0 }
0x21f4   :  { %v3350_v28 = vpop.f32.mrb[37].mxu0 }
0x21f5   :  { %5569 = vmatprep.mubr.msk.f32.mxu0 %vm100_vm0, %v3350_v28 }
0x21f6   :  { %5570 = vmatmul.mubr.msk.f32.vlgmr.msra.gmra.mrb[38].mxu0 %vm100_vm0, %v5560_v27 }
0x21f7   :  { %5594 = vmatprep.mubr.msk.f32.mxu0 %vm104_vm1, %v6647_v3 }
0x22c9   :  { %v5571_v31 = vpop.f32.mrb[38].mxu0 }
0x22ca   :  { %v3437_v24 = vadd.f32 %v6669_v23, %v5571_v31  ;;  %v3431_v32 = vpop.f32.mrb[39].mxu0 }
0x22cb   :  { %v3432_v33 = vadd.f32 %v6669_v23, %v3431_v32 }
0x22cc   :  { %v3441_v34 = vmax.f32 %v3437_v24, 0.0 }
0x22cd   :  { %v3440_v29 = vmax.f32 %v3432_v33, 0.0 }
0x22ce   :  { %v3443_v30 = vadd.f32 %v3441_v34, %v3278_v25 }
0x22cf   :  { %v3442_v38 = vadd.f32 %v3440_v29, %v3277_v18 }
0x22d0   :  { %v3449_v39 = vmul.f32 %v3447_v37, %v3443_v30 }
0x22d1   :  { %v3448_v40 = vmul.f32 %v3447_v37, %v3442_v38 }
0x22d2   :  { %v6674_v41 = vadd.f32 %v3449_v39, %v6597_v35 }
0x22d3   :  { %v6677_v42 = vadd.f32 %v3448_v40, %v6600_v36 }
0x22d4   :  { %3454 = vst.msk [vmem:[#allocation12 + $0x58] sm:$0xff] %vm100_vm0, %v6674_v41 }
0x22d5   :  { %3453 = vst.msk [vmem:[#allocation12 + $0x50] sm:$0xff] %vm100_vm0, %v6677_v42  ;;  %v5956_v43 = vpack.c.bf16 %v6674_v41, %v6677_v42 }
0x22d7   :  { %5957 = vmatprep.subr.bf16.mxu1 %v5956_v43 }
0x22d8   :  { %5959 = vmatpush3.bf16.msra.mxu1 %v5956_v43  ;;  %v4116_v43 = vstv %s4115_s17 }
0x22d9   :  { %5961 = vmatprep.subr.bf16.mxu1 %v6316_v6 }
0x22db   :  { %5577 = vmatmul.mubr.msk.f32.vlgmr.msra.gmra.mrb[40].mxu1 %vm104_vm1, %v6657_v13 }
0x22dc   :  { %5963 = vmatpush3.bf16.msra.mxu1 %v6316_v6 }
0x22dd   :  { %5965 = vmatprep.subr.bf16.mxu1 %v6321_v10 }
0x22e0   :  { %5967 = vmatpush3.bf16.msra.mxu1 %v6321_v10 }
0x23ae   :  { %v5578_v35 = vpop.f32.mrb[40].mxu1 }
0x23af   :  { %v3522_v36 = vpop.f32.mrb[41].mxu1 }
0x23b0   :  { %5587 = vmatprep.mubr.msk.f32.mxu1 %vm100_vm0, %v3522_v36 }
0x23b1   :  { %5588 = vmatmul.mubr.msk.f32.vlgmr.msra.gmra.mrb[42].mxu1 %vm100_vm0, %v5578_v35 }
0x23b2   :  { %5612 = vmatprep.mubr.msk.f32.mxu1 %vm104_vm1, %v6647_v3 }
0x2484   :  { %v5589_v44 = vpop.f32.mrb[42].mxu1 }
0x2485   :  { %v3609_v45 = vadd.f32 %v6669_v23, %v5589_v44  ;;  %v3603_v46 = vpop.f32.mrb[43].mxu1 }
0x2486   :  { %v3604_v48 = vadd.f32 %v6669_v23, %v3603_v46 }
0x2487   :  { %v3613_v49 = vmax.f32 %v3609_v45, 0.0 }
0x2488   :  { %v3612_v50 = vmax.f32 %v3604_v48, 0.0 }
0x2489   :  { %v3617_v51 = vmul.f32 %v3615_v47, %v3613_v49 }
0x248a   :  { %v3616_v52 = vmul.f32 %v3615_v47, %v3612_v50 }
0x248b   :  { %v3619_v53 = vadd.f32 %v3617_v51, %v6674_v41 }
0x248c   :  { %v3618_v54 = vadd.f32 %v3616_v52, %v6677_v42 }
0x248e   :  { %v5968_v55 = vpack.c.bf16 %v3619_v53, %v3618_v54  ;;  %v4284_v53 = vstv %s4283_s2 }
0x2490   :  { %5969 = vmatprep.subr.bf16.mxu0 %v5968_v55 }
0x2491   :  { %5971 = vmatpush3.bf16.msra.mxu0 %v5968_v55 }
0x2492   :  { %5973 = vmatprep.subr.bf16.mxu0 %v6316_v6 }
0x2494   :  { %5595 = vmatmul.mubr.msk.f32.vlgmr.msra.gmra.mrb[40].mxu0 %vm104_vm1, %v6657_v13 }
0x2495   :  { %5975 = vmatpush3.bf16.msra.mxu0 %v6316_v6 }
0x2496   :  { %5977 = vmatprep.subr.bf16.mxu0 %v6321_v10 }
0x2499   :  { %5979 = vmatpush3.bf16.msra.mxu0 %v6321_v10 }
0x2567   :  { %v5596_v56 = vpop.f32.mrb[40].mxu0 }
0x2568   :  { %v3686_v57 = vpop.f32.mrb[41].mxu0 }
0x2569   :  { %5605 = vmatprep.mubr.msk.f32.mxu0 %vm100_vm0, %v3686_v57 }
0x256a   :  { %5606 = vmatmul.mubr.msk.f32.vlgmr.msra.gmra.mrb[42].mxu0 %vm100_vm0, %v5596_v56 }
0x256b   :  { %5630 = vmatprep.mubr.msk.f32.mxu0 %vm104_vm1, %v6647_v3 }
0x263d   :  { %v5607_v58 = vpop.f32.mrb[42].mxu0 }
0x263e   :  { %v3773_v59 = vadd.f32 %v6669_v23, %v5607_v58  ;;  %v3767_v60 = vpop.f32.mrb[43].mxu0 }
0x263f   :  { %v3768_v61 = vadd.f32 %v6669_v23, %v3767_v60 }
0x2640   :  { %v3777_v62 = vmax.f32 %v3773_v59, 0.0 }
0x2641   :  { %v3776_v2 = vmax.f32 %v3768_v61, 0.0 }
0x2642   :  { %v3783_v63 = vmul.f32 %v3777_v62, %v3615_v47  ;;  %v3779_v14 = vmul.f32 2.0, %v3777_v62 }
0x2643   :  { %v3782_v4 = vmul.f32 %v3776_v2, %v3615_v47  ;;  %v3778_v19 = vmul.f32 2.0, %v3776_v2 }
0x2644   :  { %v3785_v5 = vadd.f32 %v3783_v63, %v6674_v41  ;;  %v3781_v22 = vadd.f32 %v3779_v14, %v3613_v49 }
0x2645   :  { %v3784_v9 = vadd.f32 %v3782_v4, %v6677_v42  ;;  %v3780_v18 = vadd.f32 %v3778_v19, %v3612_v50 }
0x2647   :  { %v5980_v7 = vpack.c.bf16 %v3785_v5, %v3784_v9 }
0x2649   :  { %5981 = vmatprep.subr.bf16.mxu1 %v5980_v7 }
0x264a   :  { %5983 = vmatpush3.bf16.msra.mxu1 %v5980_v7 }
0x264b   :  { %5985 = vmatprep.subr.bf16.mxu1 %v6316_v6 }
0x264d   :  { %5613 = vmatmul.mubr.msk.f32.vlgmr.msra.gmra.mrb[44].mxu1 %vm104_vm1, %v6657_v13 }
0x264e   :  { %5987 = vmatpush3.bf16.msra.mxu1 %v6316_v6 }
0x264f   :  { %5989 = vmatprep.subr.bf16.mxu1 %v6321_v10 }
0x2652   :  { %5991 = vmatpush3.bf16.msra.mxu1 %v6321_v10 }
0x2720   :  { %v5614_v8 = vpop.f32.mrb[44].mxu1 }
0x2721   :  { %v3852_v11 = vpop.f32.mrb[45].mxu1 }
0x2722   :  { %5623 = vmatprep.mubr.msk.f32.mxu1 %vm100_vm0, %v3852_v11 }
0x2723   :  { %5624 = vmatmul.mubr.msk.f32.vlgmr.msra.gmra.mrb[46].mxu1 %vm100_vm0, %v5614_v8 }
0x2724   :  { %5648 = vmatprep.mubr.msk.f32.mxu1 %vm104_vm1, %v6647_v3 }
0x27f6   :  { %v5625_v12 = vpop.f32.mrb[46].mxu1 }
0x27f7   :  { %v3939_v15 = vadd.f32 %v6669_v23, %v5625_v12  ;;  %v3933_v16 = vpop.f32.mrb[47].mxu1 }
0x27f8   :  { %v3934_v1 = vadd.f32 %v6669_v23, %v3933_v16 }
0x27f9   :  { %v3943_v20 = vmax.f32 %v3939_v15, 0.0 }
0x27fa   :  { %v3942_v21 = vmax.f32 %v3934_v1, 0.0 }
0x27fb   :  { %v3945_v25 = vmul.f32 2.0, %v3943_v20  ;;  %v3950_v17 = vmul.f32 %v3948_v0, %v3943_v20 }
0x27fc   :  { %v3944_v26 = vmul.f32 2.0, %v3942_v21  ;;  %v3949_v27 = vmul.f32 %v3948_v0, %v3942_v21 }
0x27fd   :  { %v3952_v28 = vadd.f32 %v3950_v17, %v6674_v41  ;;  %v3947_v31 = vadd.f32 %v3945_v25, %v3781_v22  ;;  %v4617_v25 = vstv %s6766_s18 }
0x27fe   :  { %v3951_v24 = vadd.f32 %v3949_v27, %v6677_v42  ;;  %v3946_v32 = vadd.f32 %v3944_v26, %v3780_v18 }
0x2800   :  { %v5992_v33 = vpack.c.bf16 %v3952_v28, %v3951_v24 }
0x2802   :  { %5993 = vmatprep.subr.bf16.mxu0 %v5992_v33 }
0x2803   :  { %5995 = vmatpush3.bf16.msra.mxu0 %v5992_v33 }
0x2804   :  { %5997 = vmatprep.subr.bf16.mxu0 %v6316_v6 }
0x2806   :  { %5631 = vmatmul.mubr.msk.f32.vlgmr.msra.gmra.mrb[44].mxu0 %vm104_vm1, %v6657_v13 }
0x2807   :  { %5999 = vmatpush3.bf16.msra.mxu0 %v6316_v6 }
0x2808   :  { %6001 = vmatprep.subr.bf16.mxu0 %v6321_v10 }
0x280b   :  { %6003 = vmatpush3.bf16.msra.mxu0 %v6321_v10 }
0x28d9   :  { %v5632_v34 = vpop.f32.mrb[44].mxu0 }
0x28da   :  { %v4019_v37 = vpop.f32.mrb[45].mxu0 }
0x28db   :  { %5641 = vmatprep.mubr.msk.f32.mxu0 %vm100_vm0, %v4019_v37 }
0x28dc   :  { %5642 = vmatmul.mubr.msk.f32.vlgmr.msra.gmra.mrb[46].mxu0 %vm100_vm0, %v5632_v34 }
0x28dd   :  { %5666 = vmatprep.mubr.msk.f32.mxu0 %vm104_vm1, %v6647_v3 }
0x29af   :  { %v5643_v29 = vpop.f32.mrb[46].mxu0 }
0x29b0   :  { %v4106_v30 = vadd.f32 %v6669_v23, %v5643_v29  ;;  %v4100_v38 = vpop.f32.mrb[47].mxu0 }
0x29b1   :  { %v4101_v39 = vadd.f32 %v6669_v23, %v4100_v38 }
0x29b2   :  { %v4110_v40 = vmax.f32 %v4106_v30, 0.0 }
0x29b3   :  { %v4109_v35 = vmax.f32 %v4101_v39, 0.0 }
0x29b4   :  { %v4112_v36 = vadd.f32 %v4110_v40, %v3947_v31 }
0x29b5   :  { %v4111_v44 = vadd.f32 %v4109_v35, %v3946_v32 }
0x29b6   :  { %v4118_v45 = vmul.f32 %v4116_v43, %v4112_v36 }
0x29b7   :  { %v4117_v46 = vmul.f32 %v4116_v43, %v4111_v44 }
0x29b8   :  { %v6745_v47 = vadd.f32 %v4118_v45, %v6674_v41  ;;  %v4785_v45 = vstv %s4784_s19 }
0x29b9   :  { %v6748_v48 = vadd.f32 %v4117_v46, %v6677_v42 }
0x29ba   :  { %4123 = vst.msk [vmem:[#allocation12 + $0x68] sm:$0xff] %vm100_vm0, %v6745_v47 }
0x29bb   :  { %4122 = vst.msk [vmem:[#allocation12 + $0x60] sm:$0xff] %vm100_vm0, %v6748_v48  ;;  %v6004_v49 = vpack.c.bf16 %v6745_v47, %v6748_v48 }
0x29bd   :  { %6005 = vmatprep.subr.bf16.mxu1 %v6004_v49 }
0x29be   :  { %6007 = vmatpush3.bf16.msra.mxu1 %v6004_v49 }
0x29bf   :  { %6009 = vmatprep.subr.bf16.mxu1 %v6316_v6 }
0x29c1   :  { %5649 = vmatmul.mubr.msk.f32.vlgmr.msra.gmra.mrb[48].mxu1 %vm104_vm1, %v6657_v13 }
0x29c2   :  { %6011 = vmatpush3.bf16.msra.mxu1 %v6316_v6 }
0x29c3   :  { %6013 = vmatprep.subr.bf16.mxu1 %v6321_v10 }
0x29c6   :  { %6015 = vmatpush3.bf16.msra.mxu1 %v6321_v10 }
0x2a94   :  { %v5650_v41 = vpop.f32.mrb[48].mxu1 }
0x2a95   :  { %v4191_v42 = vpop.f32.mrb[49].mxu1 }
0x2a96   :  { %5659 = vmatprep.mubr.msk.f32.mxu1 %vm100_vm0, %v4191_v42 }
0x2a97   :  { %5660 = vmatmul.mubr.msk.f32.vlgmr.msra.gmra.mrb[50].mxu1 %vm100_vm0, %v5650_v41 }
0x2a98   :  { %5684 = vmatprep.mubr.msk.f32.mxu1 %vm104_vm1, %v6647_v3 }
0x2b6a   :  { %v5661_v50 = vpop.f32.mrb[50].mxu1 }
0x2b6b   :  { %v4278_v51 = vadd.f32 %v6669_v23, %v5661_v50  ;;  %v4272_v52 = vpop.f32.mrb[51].mxu1 }
0x2b6c   :  { %v4273_v54 = vadd.f32 %v6669_v23, %v4272_v52 }
0x2b6d   :  { %v4282_v55 = vmax.f32 %v4278_v51, 0.0 }
0x2b6e   :  { %v4281_v56 = vmax.f32 %v4273_v54, 0.0 }
0x2b6f   :  { %v4286_v57 = vmul.f32 %v4284_v53, %v4282_v55 }
0x2b70   :  { %v4285_v58 = vmul.f32 %v4284_v53, %v4281_v56 }
0x2b71   :  { %v4288_v59 = vadd.f32 %v4286_v57, %v6745_v47 }
0x2b72   :  { %v4287_v60 = vadd.f32 %v4285_v58, %v6748_v48 }
0x2b74   :  { %v6016_v61 = vpack.c.bf16 %v4288_v59, %v4287_v60 }
0x2b76   :  { %6017 = vmatprep.subr.bf16.mxu0 %v6016_v61 }
0x2b77   :  { %6019 = vmatpush3.bf16.msra.mxu0 %v6016_v61 }
0x2b78   :  { %6021 = vmatprep.subr.bf16.mxu0 %v6316_v6 }
0x2b7a   :  { %5667 = vmatmul.mubr.msk.f32.vlgmr.msra.gmra.mrb[48].mxu0 %vm104_vm1, %v6657_v13 }
0x2b7b   :  { %6023 = vmatpush3.bf16.msra.mxu0 %v6316_v6 }
0x2b7c   :  { %6025 = vmatprep.subr.bf16.mxu0 %v6321_v10 }
0x2b7f   :  { %6027 = vmatpush3.bf16.msra.mxu0 %v6321_v10 }
0x2c4d   :  { %v5668_v62 = vpop.f32.mrb[48].mxu0 }
0x2c4e   :  { %v4355_v2 = vpop.f32.mrb[49].mxu0 }
0x2c4f   :  { %5677 = vmatprep.mubr.msk.f32.mxu0 %vm100_vm0, %v4355_v2 }
0x2c50   :  { %5678 = vmatmul.mubr.msk.f32.vlgmr.msra.gmra.mrb[50].mxu0 %vm100_vm0, %v5668_v62 }
0x2c51   :  { %5702 = vmatprep.mubr.msk.f32.mxu0 %vm104_vm1, %v6647_v3 }
0x2d23   :  { %v5679_v63 = vpop.f32.mrb[50].mxu0 }
0x2d24   :  { %v4442_v4 = vadd.f32 %v6669_v23, %v5679_v63  ;;  %v4436_v5 = vpop.f32.mrb[51].mxu0 }
0x2d25   :  { %v4437_v9 = vadd.f32 %v6669_v23, %v4436_v5 }
0x2d26   :  { %v4446_v7 = vmax.f32 %v4442_v4, 0.0 }
0x2d27   :  { %v4445_v8 = vmax.f32 %v4437_v9, 0.0 }
0x2d28   :  { %v4452_v11 = vmul.f32 %v4446_v7, %v4284_v53  ;;  %v4448_v1 = vmul.f32 2.0, %v4446_v7 }
0x2d29   :  { %v4451_v12 = vmul.f32 %v4445_v8, %v4284_v53  ;;  %v4447_v22 = vmul.f32 2.0, %v4445_v8 }
0x2d2a   :  { %v4454_v14 = vadd.f32 %v4452_v11, %v6745_v47  ;;  %v4450_v27 = vadd.f32 %v4448_v1, %v4282_v55 }
0x2d2b   :  { %v4453_v15 = vadd.f32 %v4451_v12, %v6748_v48  ;;  %v4449_v24 = vadd.f32 %v4447_v22, %v4281_v56 }
0x2d2d   :  { %v6028_v16 = vpack.c.bf16 %v4454_v14, %v4453_v15 }
0x2d2f   :  { %6029 = vmatprep.subr.bf16.mxu1 %v6028_v16 }
0x2d30   :  { %6031 = vmatpush3.bf16.msra.mxu1 %v6028_v16 }
0x2d31   :  { %6033 = vmatprep.subr.bf16.mxu1 %v6316_v6 }
0x2d33   :  { %5685 = vmatmul.mubr.msk.f32.vlgmr.msra.gmra.mrb[52].mxu1 %vm104_vm1, %v6657_v13 }
0x2d34   :  { %6035 = vmatpush3.bf16.msra.mxu1 %v6316_v6 }
0x2d35   :  { %6037 = vmatprep.subr.bf16.mxu1 %v6321_v10 }
0x2d38   :  { %6039 = vmatpush3.bf16.msra.mxu1 %v6321_v10 }
0x2e06   :  { %v5686_v3 = vpop.f32.mrb[52].mxu1 }
0x2e07   :  { %v4521_v19 = vpop.f32.mrb[53].mxu1 }
0x2e08   :  { %5695 = vmatprep.mubr.msk.f32.mxu1 %vm100_vm0, %v4521_v19 }
0x2e09   :  { %5696 = vmatmul.mubr.msk.f32.vlgmr.msra.gmra.mrb[54].mxu1 %vm100_vm0, %v5686_v3 }
0x2edc   :  { %v5697_v0 = vpop.f32.mrb[54].mxu1 }
0x2edd   :  { %v4608_v20 = vadd.f32 %v6669_v23, %v5697_v0  ;;  %v4602_v21 = vpop.f32.mrb[55].mxu1 }
0x2ede   :  { %v4603_v17 = vadd.f32 %v6669_v23, %v4602_v21 }
0x2edf   :  { %v4612_v18 = vmax.f32 %v4608_v20, 0.0 }
0x2ee0   :  { %v4611_v26 = vmax.f32 %v4603_v17, 0.0 }
0x2ee1   :  { %v4614_v28 = vmul.f32 2.0, %v4612_v18  ;;  %v4619_v31 = vmul.f32 %v4617_v25, %v4612_v18 }
0x2ee2   :  { %v4613_v32 = vmul.f32 2.0, %v4611_v26  ;;  %v4618_v33 = vmul.f32 %v4617_v25, %v4611_v26 }
0x2ee3   :  { %v4621_v34 = vadd.f32 %v4619_v31, %v6745_v47  ;;  %v4616_v37 = vadd.f32 %v4614_v28, %v4450_v27 }
0x2ee4   :  { %v4620_v29 = vadd.f32 %v4618_v33, %v6748_v48  ;;  %v4615_v30 = vadd.f32 %v4613_v32, %v4449_v24 }
0x2ee6   :  { %v6040_v38 = vpack.c.bf16 %v4621_v34, %v4620_v29 }
0x2ee8   :  { %6041 = vmatprep.subr.bf16.mxu0 %v6040_v38 }
0x2ee9   :  { %6043 = vmatpush3.bf16.msra.mxu0 %v6040_v38 }
0x2eea   :  { %6045 = vmatprep.subr.bf16.mxu0 %v6316_v6 }
0x2eec   :  { %5703 = vmatmul.mubr.msk.f32.vlgmr.msra.gmra.mrb[52].mxu0 %vm104_vm1, %v6657_v13 }
0x2eed   :  { %6047 = vmatpush3.bf16.msra.mxu0 %v6316_v6 }
0x2eee   :  { %6049 = vmatprep.subr.bf16.mxu0 %v6321_v10 }
0x2ef1   :  { %6051 = vmatpush3.bf16.msra.mxu0 %v6321_v10 }
0x2fbf   :  { %v5704_v39 = vpop.f32.mrb[52].mxu0 }
0x2fc0   :  { %v4688_v40 = vpop.f32.mrb[53].mxu0 }
0x2fc1   :  { %5713 = vmatprep.mubr.msk.f32.mxu0 %vm100_vm0, %v4688_v40 }
0x2fc2   :  { %5714 = vmatmul.mubr.msk.f32.vlgmr.msra.gmra.mrb[54].mxu0 %vm100_vm0, %v5704_v39 }
0x3095   :  { %v5715_v43 = vpop.f32.mrb[54].mxu0 }
0x3096   :  { %v4775_v35 = vadd.f32 %v6669_v23, %v5715_v43  ;;  %v4769_v36 = vpop.f32.mrb[55].mxu0 }
0x3097   :  { %v4770_v44 = vadd.f32 %v6669_v23, %v4769_v36 }
0x3098   :  { %v4779_v13 = vmax.f32 %v4775_v35, 0.0 }
0x3099   :  { %v4778_v6 = vmax.f32 %v4770_v44, 0.0 }
0x309a   :  { %v4781_v46 = vadd.f32 %v4779_v13, %v4616_v37 }
0x309b   :  { %v4780_v49 = vadd.f32 %v4778_v6, %v4615_v30 }
0x309c   :  { %v4787_v41 = vmul.f32 %v4785_v45, %v4781_v46 }
0x309d   :  { %v4786_v10 = vmul.f32 %v4785_v45, %v4780_v49 }
0x309e   :  { %v4789_v42 = vadd.f32 %v4787_v41, %v6745_v47 }
0x309f   :  { %v4788_v50 = vadd.f32 %v4786_v10, %v6748_v48 }
0x30a0   :  { %4792 = vst.msk [vmem:[#allocation12 + $0x78] sm:$0xff] %vm100_vm0, %v4789_v42 }
0x30a1   :  { %4791 = vst.msk [vmem:[#allocation12 + $0x70] sm:$0xff] %vm100_vm0, %v4788_v50 }
0x30a2   :  { %6172 = shalt.err (!%p6169_p11)
}
0x30a3   :  { %s6173_s3 = scalar_lea.hbm %s6835_s5, 2048 }
0x30a4   :  { %p6174_p12 = scmp.ne.s32.totalorder %s6835_s5, %s6173_s3  ;;  %p6177_p13 = scmp.lt.u32.totalorder %s6173_s3, %s6835_s5 }
0x30a6   :  { %p6179_p0 = pnand %p6177_p13, %p6174_p12 }
0x30a8   :  { %6182 = shalt.err (!%p6179_p0)
}
0x30a9   :  { %4804 = dma.vmem_to_hbm [thread:$0]  %s4799_s22, 2048, %s6835_s5, [#allocation4], %s6195_s30, %s6195_s30, %s6196_s6  }
0x30aa   :  { %6191 = dma.done.wait [#allocation4], 2048  }
0x30ab   :  { %6192 = vsyncadd [#allocation4], 4294965248 }
0x30ac   :  { %4808 = vsyncpa [#allocation3], 1 }
0x30ad   :  { %4809 = vsyncpa [#allocation8], 1 }
0x30ae   :  { %4810 = vsyncpa [#allocation11], 1 }
0x30af   :  { %4811 = vsyncpa [#allocation4], 1 }
0x30b0   :  { %4812 = vsyncpa [#allocation5], 1 }

</bundles_post_ra>
